<compile_context>
chip_gen: v6e
topology: v6e:2x2x1
jax: 0.10.0
libtpu: 0.0.40
codegen_flags: <defaults>
</compile_context>

<pallas_src>
import jax
import jax.numpy as jnp
from jax.experimental import pallas as pl
from jax.experimental.pallas import tpu as pltpu


# ----------------------------------------------------------------------------
# Pallas kernel: full GNN forward (4 chained message-passing layers)
# ----------------------------------------------------------------------------
def gnn_kernel(
    # graph tensors
    x_ref, ea_ref, src_ref, dst_ref,
    # learned mixing scalars [w2_1, w2_2, w3_1, w3_2, w3_3] (SMEM)
    scal_ref,
    # batched edge MLP (all four layers packed along lanes)
    we_all_ref, be_all_ref,
    # per-layer params: wn, bn, wu(=[wua;wub]), bu
    wn1, bn1, wu1, bu1,
    wn2, bn2, wu2, bu2,
    wn3, bn3, wu3, bu3,
    wn4, bn4, wu4, bu4,
    # output
    out_ref,
):
    f32 = jnp.float32
    bf16 = jnp.bfloat16
    relu = lambda v: jnp.maximum(v, 0.0)

    x = x_ref[...]                      # (N, F_node)  f32
    ea_bf = ea_ref[...].astype(bf16)    # hoisted cast, reused by batched edge MLP
    N = x.shape[0]
    E = ea_bf.shape[0]

    # Gather/scatter one-hot operators built in-kernel, directly in bf16.
    # 0/1 values are exact in bf16; padded edges carry index -1 -> zero row/col.
    src = src_ref[...]                  # (E, 1) int32
    dst = dst_ref[...]                  # (1, E) int32
    src_oh = (jax.lax.broadcasted_iota(jnp.int32, (E, N), 1) == src).astype(bf16)
    dst_oh_t = (jax.lax.broadcasted_iota(jnp.int32, (N, E), 0) == dst).astype(bf16)

    # All four edge MLPs in a single matmul (edge_attr is layer-invariant).
    h_edge_all = relu(
        jnp.dot(ea_bf, we_all_ref[...], preferred_element_type=f32) + be_all_ref[...]
    )
    w1 = wn1.shape[1]
    w2 = wn2.shape[1]
    w3 = wn3.shape[1]
    w4 = wn4.shape[1]
    he = (
        h_edge_all[:, :w1],
        h_edge_all[:, w1:w1 + w2],
        h_edge_all[:, w1 + w2:w1 + w2 + w3],
        h_edge_all[:, w1 + w2 + w3:w1 + w2 + w3 + w4],
    )

    def layer(h_in, h_edge, wn, bn, wu, bu):
        h_node = relu(
            jnp.dot(h_in.astype(bf16), wn[...], preferred_element_type=f32) + bn[...]
        )                                                       # (N, H)  f32
        h_node_bf = h_node.astype(bf16)                         # hoisted: gather + update
        x_src = jnp.dot(src_oh, h_node_bf, preferred_element_type=f32)   # (E, H)
        msg = x_src * h_edge                                    # (E, H) f32 (VPU)
        agg = jnp.dot(dst_oh_t, msg.astype(bf16), preferred_element_type=f32)  # (N, H)
        # Fused update: concat([h_node, agg]) @ [Wua; Wub] — single MXU drain.
        upd_in = jnp.concatenate([h_node_bf, agg.astype(bf16)], axis=1)  # (N, 2H) bf16
        return relu(jnp.dot(upd_in, wu[...], preferred_element_type=f32) + bu[...])

    x1 = layer(x, he[0], wn1, bn1, wu1, bu1)
    x2 = layer(x1, he[1], wn2, bn2, wu2, bu2)

    w2_1 = scal_ref[0]
    w2_2 = scal_ref[1]
    w3_1 = scal_ref[2]
    w3_2 = scal_ref[3]
    w3_3 = scal_ref[4]

    x2w = x1 * w2_1 + x2 * w2_2
    x3 = layer(x2w, he[2], wn3, bn3, wu3, bu3)
    x3w = x1 * w3_1 + x2w * w3_2 + x3 * w3_3
    out_ref[...] = layer(x3w, he[3], wn4, bn4, wu4, bu4).astype(out_ref.dtype)


# ----------------------------------------------------------------------------
# Wrapper: pad to TPU-friendly shapes, pack/cast weights, call the kernel
# ----------------------------------------------------------------------------
def _round_up(v, m):
    return ((v + m - 1) // m) * m


def _pad2(a, shape, dtype):
    out = jnp.zeros(shape, dtype)
    return out.at[: a.shape[0], : a.shape[1]].set(a.astype(dtype))


def gnn_forward(x, edge_index, edge_attr, params):
    f32, bf16 = jnp.float32, jnp.bfloat16

    N, node_in = x.shape
    E, edge_in = edge_attr.shape
    H = params["layer1"]["wn"].shape[1]
    OUT = params["layer_last"]["wn"].shape[1]

    # Lane-dense feature dims (multiple of 128), sublane-aligned row dims.
    N_p = _round_up(N, 8)
    E_p = _round_up(E, 8)
    H_p = _round_up(H, 128)
    O_p = _round_up(OUT, 128)

    x_p = _pad2(x, (N_p, node_in), f32)
    ea_p = _pad2(edge_attr, (E_p, edge_in), f32)

    # Padded edges get index -1 -> zero one-hot row/col (no contribution).
    # TODO(synk): at real E move indices to SMEM scalar prefetch; (E,1) lane
    # padding is negligible at toy sizes.
    src = jnp.full((E_p, 1), -1, jnp.int32).at[:E, 0].set(edge_index[0].astype(jnp.int32))
    dst = jnp.full((1, E_p), -1, jnp.int32).at[0, :E].set(edge_index[1].astype(jnp.int32))

    scalars = jnp.stack(
        [params["w2_1"], params["w2_2"], params["w3_1"], params["w3_2"], params["w3_3"]]
    ).astype(f32)

    layer_params = [params["layer1"], params["layer2"], params["layer3"], params["layer_last"]]
    widths_p = [H_p, H_p, H_p, O_p]
    total_w = sum(widths_p)

    # Batched edge MLP weights: (edge_in, 3*H_p + O_p), 128-aligned per-layer slabs.
    we_all = jnp.zeros((edge_in, total_w), bf16)
    be_all = jnp.zeros((1, total_w), f32)
    off = 0
    for p_l, w_p in zip(layer_params, widths_p):
        we = p_l["we"]
        be = p_l["be"]
        we_all = we_all.at[:, off:off + we.shape[1]].set(we.astype(bf16))
        be_all = be_all.at[:, off:off + we.shape[1]].set(be.astype(f32))
        off += w_p

    # Per-layer node-MLP + fused-update weights.  Pad wua/wub separately, then
    # stack along K so the kernel's concat([h_node, agg]) layout matches.
    def pack_layer(p, kin, w_p):
        wn = _pad2(p["wn"], (kin, w_p), bf16)
        bn = _pad2(p["bn"], (1, w_p), f32)
        wua = _pad2(p["wua"], (w_p, w_p), bf16)
        wub = _pad2(p["wub"], (w_p, w_p), bf16)
        wu = jnp.concatenate([wua, wub], axis=0)        # (2*w_p, w_p)
        bu = _pad2(p["bu"], (1, w_p), f32)
        return [wn, bn, wu, bu]

    layer_tensors = (
        pack_layer(params["layer1"], node_in, H_p)
        + pack_layer(params["layer2"], H_p, H_p)
        + pack_layer(params["layer3"], H_p, H_p)
        + pack_layer(params["layer_last"], H_p, O_p)
    )

    # Advisory cost estimate for XLA's scheduler.
    flops = 2 * E_p * edge_in * total_w                 # batched edge MLP
    for kin, w in zip([node_in, H_p, H_p, H_p], widths_p):
        flops += 2 * N_p * kin * w                      # node MLP
        flops += 2 * E_p * N_p * w                      # gather (one-hot matmul)
        flops += 2 * N_p * E_p * w                      # scatter (one-hot matmul)
        flops += 2 * N_p * (2 * w) * w                  # fused update matmul
    all_inputs = [x_p, ea_p, src, dst, scalars, we_all, be_all] + layer_tensors
    bytes_accessed = (
        sum(int(t.size) * t.dtype.itemsize for t in all_inputs) + N_p * O_p * 4
    )
    cost = pl.CostEstimate(flops=flops, transcendentals=0, bytes_accessed=bytes_accessed)

    vmem = pl.BlockSpec(memory_space=pltpu.MemorySpace.VMEM)
    smem = pl.BlockSpec(memory_space=pltpu.MemorySpace.SMEM)
    in_specs = [vmem, vmem, vmem, vmem, smem, vmem, vmem] + [vmem] * len(layer_tensors)

    out_p = pl.pallas_call(
        gnn_kernel,
        out_shape=jax.ShapeDtypeStruct((N_p, O_p), f32),
        in_specs=in_specs,
        out_specs=vmem,
        # Sized within v7x's 64 MiB physical VMEM (also valid on v5e/v6e).
        compiler_params=pltpu.CompilerParams(vmem_limit_bytes=48 * 1024 * 1024),
        cost_estimate=cost,
    )(x_p, ea_p, src, dst, scalars, we_all, be_all, *layer_tensors)

    # Padded node rows hold garbage (relu(bn) propagated); slice them off here.
    return out_p[:N, :OUT]


# ----------------------------------------------------------------------------
# Pure-JAX fp32 reference (same math) for a correctness check
# ----------------------------------------------------------------------------
def _layer_ref(x, edge_index, edge_attr, p):
    relu = lambda v: jnp.maximum(v, 0.0)
    src, dst = edge_index[0], edge_index[1]
    h_node = relu(x @ p["wn"] + p["bn"])
    h_edge = relu(edge_attr @ p["we"] + p["be"])
    msg = h_node[src] * h_edge
    agg = jnp.zeros((x.shape[0], h_node.shape[1]), jnp.float32).at[dst].add(msg)
    return relu(h_node @ p["wua"] + agg @ p["wub"] + p["bu"])


def gnn_ref(x, edge_index, edge_attr, params):
    x1 = _layer_ref(x, edge_index, edge_attr, params["layer1"])
    x2 = _layer_ref(x1, edge_index, edge_attr, params["layer2"])
    x2w = x1 * params["w2_1"] + x2 * params["w2_2"]
    x3 = _layer_ref(x2w, edge_index, edge_attr, params["layer3"])
    x3w = x1 * params["w3_1"] + x2w * params["w3_2"] + x3 * params["w3_3"]
    return _layer_ref(x3w, edge_index, edge_attr, params["layer_last"])


# ----------------------------------------------------------------------------
# Deterministic parameter init (mimics nn.Linear uniform(-1/sqrt(fan_in), ..))
# ----------------------------------------------------------------------------
def _init_layer(key, node_in, edge_in, out):
    ks = jax.random.split(key, 7)
    u = lambda k, shape, fan_in: jax.random.uniform(
        k, shape, jnp.float32, -1.0 / jnp.sqrt(fan_in), 1.0 / jnp.sqrt(fan_in)
    )
    return {
        "wn": u(ks[0], (node_in, out), node_in),
        "bn": u(ks[1], (1, out), node_in),
        "we": u(ks[2], (edge_in, out), edge_in),
        "be": u(ks[3], (1, out), edge_in),
        "wua": u(ks[4], (out, out), 2 * out),
        "wub": u(ks[5], (out, out), 2 * out),
        "bu": u(ks[6], (1, out), 2 * out),
    }


def init_params(key, node_in, edge_in, hidden, out):
    k1, k2, k3, k4 = jax.random.split(key, 4)
    return {
        "layer1": _init_layer(k1, node_in, edge_in, hidden),
        "layer2": _init_layer(k2, hidden, edge_in, hidden),
        "layer3": _init_layer(k3, hidden, edge_in, hidden),
        "layer_last": _init_layer(k4, hidden, edge_in, out),
        "w2_1": jnp.float32(0.6),
        "w2_2": jnp.float32(0.4),
        "w3_1": jnp.float32(0.6),
        "w3_2": jnp.float32(0.4),
        "w3_3": jnp.float32(0.2),
    }


if __name__ == "__main__":
    key = jax.random.PRNGKey(0)
    k_x, k_e, k_src, k_dst, k_p = jax.random.split(key, 5)

    N, E = 16, 32
    NODE_IN, EDGE_IN, HIDDEN, OUT = 8, 4, 32, 16

    x = jax.random.normal(k_x, (N, NODE_IN), jnp.float32)
    edge_attr = jax.random.normal(k_e, (E, EDGE_IN), jnp.float32)
    edge_index = jnp.stack(
        [
            jax.random.randint(k_src, (E,), 0, N),
            jax.random.randint(k_dst, (E,), 0, N),
        ]
    ).astype(jnp.int32)

    params = init_params(k_p, NODE_IN, EDGE_IN, HIDDEN, OUT)

    out = gnn_forward(x, edge_index, edge_attr, params)
    out = jax.block_until_ready(out)

    ref = gnn_ref(x, edge_index, edge_attr, params)
    assert out.shape == (N, OUT)
    # bf16 matmul inputs (f32 accumulation) across 4 chained layers -> loose
    # relative tolerance against the fp32 reference.
    rel_err = float(jnp.max(jnp.abs(out - ref)) / (jnp.max(jnp.abs(ref)) + 1e-8))
    assert rel_err < 5e-2, f"mismatch vs reference (rel_err={rel_err})"

    print("KERNEL_OK")
</pallas_src>

<mosaic_0001>
module attributes {stable_mosaic.version = 11 : i64} {
  func.func @gnn_kernel(%arg0: memref<16x8xf32, #tpu.memory_space<vmem>>, %arg1: memref<32x4xf32, #tpu.memory_space<vmem>>, %arg2: memref<32x1xi32, #tpu.memory_space<vmem>>, %arg3: memref<1x32xi32, #tpu.memory_space<vmem>>, %arg4: memref<5xf32, #tpu.memory_space<smem>>, %arg5: memref<4x512xbf16, #tpu.memory_space<vmem>>, %arg6: memref<1x512xf32, #tpu.memory_space<vmem>>, %arg7: memref<8x128xbf16, #tpu.memory_space<vmem>>, %arg8: memref<1x128xf32, #tpu.memory_space<vmem>>, %arg9: memref<256x128xbf16, #tpu.memory_space<vmem>>, %arg10: memref<1x128xf32, #tpu.memory_space<vmem>>, %arg11: memref<128x128xbf16, #tpu.memory_space<vmem>>, %arg12: memref<1x128xf32, #tpu.memory_space<vmem>>, %arg13: memref<256x128xbf16, #tpu.memory_space<vmem>>, %arg14: memref<1x128xf32, #tpu.memory_space<vmem>>, %arg15: memref<128x128xbf16, #tpu.memory_space<vmem>>, %arg16: memref<1x128xf32, #tpu.memory_space<vmem>>, %arg17: memref<256x128xbf16, #tpu.memory_space<vmem>>, %arg18: memref<1x128xf32, #tpu.memory_space<vmem>>, %arg19: memref<128x128xbf16, #tpu.memory_space<vmem>>, %arg20: memref<1x128xf32, #tpu.memory_space<vmem>>, %arg21: memref<256x128xbf16, #tpu.memory_space<vmem>>, %arg22: memref<1x128xf32, #tpu.memory_space<vmem>>, %arg23: memref<16x128xf32, #tpu.memory_space<vmem>>) attributes {dimension_semantics = [], scalar_prefetch = 0 : i64, scratch_operands = 0 : i64, tpu.core_type = #tpu.core_type<tc>} {
    %c0 = arith.constant 0 : index
    %c0_0 = arith.constant 0 : index
    %0 = vector.load %arg0[%c0, %c0_0] : memref<16x8xf32, #tpu.memory_space<vmem>>, vector<16x8xf32>
    %c0_1 = arith.constant 0 : index
    %c0_2 = arith.constant 0 : index
    %1 = vector.load %arg1[%c0_1, %c0_2] : memref<32x4xf32, #tpu.memory_space<vmem>>, vector<32x4xf32>
    %2 = arith.truncf %1 : vector<32x4xf32> to vector<32x4xbf16>
    %c0_3 = arith.constant 0 : index
    %c0_4 = arith.constant 0 : index
    %3 = vector.load %arg2[%c0_3, %c0_4] : memref<32x1xi32, #tpu.memory_space<vmem>>, vector<32x1xi32>
    %c0_5 = arith.constant 0 : index
    %c0_6 = arith.constant 0 : index
    %4 = vector.load %arg3[%c0_5, %c0_6] : memref<1x32xi32, #tpu.memory_space<vmem>>, vector<1x32xi32>
    %5 = tpu.iota {dimensions = array<i32: 1>} : vector<32x16xi32>
    %6 = vector.broadcast %3 : vector<32x1xi32> to vector<32x16xi32>
    %7 = arith.cmpi eq, %5, %6 : vector<32x16xi32>
    %8 = arith.extui %7 : vector<32x16xi1> to vector<32x16xi32>
    %9 = arith.sitofp %8 : vector<32x16xi32> to vector<32x16xf32>
    %10 = arith.truncf %9 : vector<32x16xf32> to vector<32x16xbf16>
    %11 = tpu.iota {dimensions = array<i32: 0>} : vector<16x32xi32>
    %12 = vector.broadcast %4 : vector<1x32xi32> to vector<16x32xi32>
    %13 = arith.cmpi eq, %11, %12 : vector<16x32xi32>
    %14 = arith.extui %13 : vector<16x32xi1> to vector<16x32xi32>
    %15 = arith.sitofp %14 : vector<16x32xi32> to vector<16x32xf32>
    %16 = arith.truncf %15 : vector<16x32xf32> to vector<16x32xbf16>
    %c0_7 = arith.constant 0 : index
    %c0_8 = arith.constant 0 : index
    %17 = vector.load %arg5[%c0_7, %c0_8] : memref<4x512xbf16, #tpu.memory_space<vmem>>, vector<4x512xbf16>
    %cst = arith.constant dense<0.000000e+00> : vector<32x512xf32>
    %18 = tpu.matmul %2, %17, %cst {dimension_numbers = #tpu.dot_dimension_numbers<[1], [0], [0], [1], [0, 0, 1, 1], [], []>} : vector<32x4xbf16>, vector<4x512xbf16>, vector<32x512xf32> -> vector<32x512xf32>
    %c0_9 = arith.constant 0 : index
    %c0_10 = arith.constant 0 : index
    %19 = vector.load %arg6[%c0_9, %c0_10] : memref<1x512xf32, #tpu.memory_space<vmem>>, vector<1x512xf32>
    %20 = vector.broadcast %19 : vector<1x512xf32> to vector<32x512xf32>
    %21 = arith.addf %18, %20 : vector<32x512xf32>
    %cst_11 = arith.constant 0.000000e+00 : f32
    %22 = vector.broadcast %cst_11 : f32 to vector<32x512xf32>
    %23 = arith.maximumf %21, %22 : vector<32x512xf32>
    %24 = vector.extract_strided_slice %23 {offsets = [0, 0], sizes = [32, 128], strides = [1, 1]} : vector<32x512xf32> to vector<32x128xf32>
    %25 = vector.extract_strided_slice %23 {offsets = [0, 128], sizes = [32, 128], strides = [1, 1]} : vector<32x512xf32> to vector<32x128xf32>
    %26 = vector.extract_strided_slice %23 {offsets = [0, 256], sizes = [32, 128], strides = [1, 1]} : vector<32x512xf32> to vector<32x128xf32>
    %27 = vector.extract_strided_slice %23 {offsets = [0, 384], sizes = [32, 128], strides = [1, 1]} : vector<32x512xf32> to vector<32x128xf32>
    %28 = arith.truncf %0 : vector<16x8xf32> to vector<16x8xbf16>
    %c0_12 = arith.constant 0 : index
    %c0_13 = arith.constant 0 : index
    %29 = vector.load %arg7[%c0_12, %c0_13] : memref<8x128xbf16, #tpu.memory_space<vmem>>, vector<8x128xbf16>
    %cst_14 = arith.constant dense<0.000000e+00> : vector<16x128xf32>
    %30 = tpu.matmul %28, %29, %cst_14 {dimension_numbers = #tpu.dot_dimension_numbers<[1], [0], [0], [1], [0, 0, 1, 1], [], []>} : vector<16x8xbf16>, vector<8x128xbf16>, vector<16x128xf32> -> vector<16x128xf32>
    %c0_15 = arith.constant 0 : index
    %c0_16 = arith.constant 0 : index
    %31 = vector.load %arg8[%c0_15, %c0_16] : memref<1x128xf32, #tpu.memory_space<vmem>>, vector<1x128xf32>
    %32 = vector.broadcast %31 : vector<1x128xf32> to vector<16x128xf32>
    %33 = arith.addf %30, %32 : vector<16x128xf32>
    %cst_17 = arith.constant 0.000000e+00 : f32
    %34 = vector.broadcast %cst_17 : f32 to vector<16x128xf32>
    %35 = arith.maximumf %33, %34 : vector<16x128xf32>
    %36 = arith.truncf %35 : vector<16x128xf32> to vector<16x128xbf16>
    %cst_18 = arith.constant dense<0.000000e+00> : vector<32x128xf32>
    %37 = tpu.matmul %10, %36, %cst_18 {dimension_numbers = #tpu.dot_dimension_numbers<[1], [0], [0], [1], [0, 0, 1, 1], [], []>} : vector<32x16xbf16>, vector<16x128xbf16>, vector<32x128xf32> -> vector<32x128xf32>
    %38 = arith.mulf %37, %24 : vector<32x128xf32>
    %39 = arith.truncf %38 : vector<32x128xf32> to vector<32x128xbf16>
    %cst_19 = arith.constant dense<0.000000e+00> : vector<16x128xf32>
    %40 = tpu.matmul %16, %39, %cst_19 {dimension_numbers = #tpu.dot_dimension_numbers<[1], [0], [0], [1], [0, 0, 1, 1], [], []>} : vector<16x32xbf16>, vector<32x128xbf16>, vector<16x128xf32> -> vector<16x128xf32>
    %41 = arith.truncf %40 : vector<16x128xf32> to vector<16x128xbf16>
    %42 = tpu.concatenate %36, %41 in 1 : vector<16x128xbf16>, vector<16x128xbf16> -> vector<16x256xbf16>
    %c0_20 = arith.constant 0 : index
    %c0_21 = arith.constant 0 : index
    %43 = vector.load %arg9[%c0_20, %c0_21] : memref<256x128xbf16, #tpu.memory_space<vmem>>, vector<256x128xbf16>
    %cst_22 = arith.constant dense<0.000000e+00> : vector<16x128xf32>
    %44 = tpu.matmul %42, %43, %cst_22 {dimension_numbers = #tpu.dot_dimension_numbers<[1], [0], [0], [1], [0, 0, 1, 1], [], []>} : vector<16x256xbf16>, vector<256x128xbf16>, vector<16x128xf32> -> vector<16x128xf32>
    %c0_23 = arith.constant 0 : index
    %c0_24 = arith.constant 0 : index
    %45 = vector.load %arg10[%c0_23, %c0_24] : memref<1x128xf32, #tpu.memory_space<vmem>>, vector<1x128xf32>
    %46 = vector.broadcast %45 : vector<1x128xf32> to vector<16x128xf32>
    %47 = arith.addf %44, %46 : vector<16x128xf32>
    %cst_25 = arith.constant 0.000000e+00 : f32
    %48 = vector.broadcast %cst_25 : f32 to vector<16x128xf32>
    %49 = arith.maximumf %47, %48 : vector<16x128xf32>
    %50 = arith.truncf %49 : vector<16x128xf32> to vector<16x128xbf16>
    %c0_26 = arith.constant 0 : index
    %c0_27 = arith.constant 0 : index
    %51 = vector.load %arg11[%c0_26, %c0_27] : memref<128x128xbf16, #tpu.memory_space<vmem>>, vector<128x128xbf16>
    %cst_28 = arith.constant dense<0.000000e+00> : vector<16x128xf32>
    %52 = tpu.matmul %50, %51, %cst_28 {dimension_numbers = #tpu.dot_dimension_numbers<[1], [0], [0], [1], [0, 0, 1, 1], [], []>} : vector<16x128xbf16>, vector<128x128xbf16>, vector<16x128xf32> -> vector<16x128xf32>
    %c0_29 = arith.constant 0 : index
    %c0_30 = arith.constant 0 : index
    %53 = vector.load %arg12[%c0_29, %c0_30] : memref<1x128xf32, #tpu.memory_space<vmem>>, vector<1x128xf32>
    %54 = vector.broadcast %53 : vector<1x128xf32> to vector<16x128xf32>
    %55 = arith.addf %52, %54 : vector<16x128xf32>
    %cst_31 = arith.constant 0.000000e+00 : f32
    %56 = vector.broadcast %cst_31 : f32 to vector<16x128xf32>
    %57 = arith.maximumf %55, %56 : vector<16x128xf32>
    %58 = arith.truncf %57 : vector<16x128xf32> to vector<16x128xbf16>
    %cst_32 = arith.constant dense<0.000000e+00> : vector<32x128xf32>
    %59 = tpu.matmul %10, %58, %cst_32 {dimension_numbers = #tpu.dot_dimension_numbers<[1], [0], [0], [1], [0, 0, 1, 1], [], []>} : vector<32x16xbf16>, vector<16x128xbf16>, vector<32x128xf32> -> vector<32x128xf32>
    %60 = arith.mulf %59, %25 : vector<32x128xf32>
    %61 = arith.truncf %60 : vector<32x128xf32> to vector<32x128xbf16>
    %cst_33 = arith.constant dense<0.000000e+00> : vector<16x128xf32>
    %62 = tpu.matmul %16, %61, %cst_33 {dimension_numbers = #tpu.dot_dimension_numbers<[1], [0], [0], [1], [0, 0, 1, 1], [], []>} : vector<16x32xbf16>, vector<32x128xbf16>, vector<16x128xf32> -> vector<16x128xf32>
    %63 = arith.truncf %62 : vector<16x128xf32> to vector<16x128xbf16>
    %64 = tpu.concatenate %58, %63 in 1 : vector<16x128xbf16>, vector<16x128xbf16> -> vector<16x256xbf16>
    %c0_34 = arith.constant 0 : index
    %c0_35 = arith.constant 0 : index
    %65 = vector.load %arg13[%c0_34, %c0_35] : memref<256x128xbf16, #tpu.memory_space<vmem>>, vector<256x128xbf16>
    %cst_36 = arith.constant dense<0.000000e+00> : vector<16x128xf32>
    %66 = tpu.matmul %64, %65, %cst_36 {dimension_numbers = #tpu.dot_dimension_numbers<[1], [0], [0], [1], [0, 0, 1, 1], [], []>} : vector<16x256xbf16>, vector<256x128xbf16>, vector<16x128xf32> -> vector<16x128xf32>
    %c0_37 = arith.constant 0 : index
    %c0_38 = arith.constant 0 : index
    %67 = vector.load %arg14[%c0_37, %c0_38] : memref<1x128xf32, #tpu.memory_space<vmem>>, vector<1x128xf32>
    %68 = vector.broadcast %67 : vector<1x128xf32> to vector<16x128xf32>
    %69 = arith.addf %66, %68 : vector<16x128xf32>
    %cst_39 = arith.constant 0.000000e+00 : f32
    %70 = vector.broadcast %cst_39 : f32 to vector<16x128xf32>
    %71 = arith.maximumf %69, %70 : vector<16x128xf32>
    %c0_40 = arith.constant 0 : index
    %72 = memref.load %arg4[%c0_40] : memref<5xf32, #tpu.memory_space<smem>>
    %c1 = arith.constant 1 : index
    %73 = memref.load %arg4[%c1] : memref<5xf32, #tpu.memory_space<smem>>
    %c2 = arith.constant 2 : index
    %74 = memref.load %arg4[%c2] : memref<5xf32, #tpu.memory_space<smem>>
    %c3 = arith.constant 3 : index
    %75 = memref.load %arg4[%c3] : memref<5xf32, #tpu.memory_space<smem>>
    %c4 = arith.constant 4 : index
    %76 = memref.load %arg4[%c4] : memref<5xf32, #tpu.memory_space<smem>>
    %77 = vector.broadcast %72 : f32 to vector<16x128xf32>
    %78 = arith.mulf %49, %77 : vector<16x128xf32>
    %79 = vector.broadcast %73 : f32 to vector<16x128xf32>
    %80 = arith.mulf %71, %79 : vector<16x128xf32>
    %81 = arith.addf %78, %80 : vector<16x128xf32>
    %82 = arith.truncf %81 : vector<16x128xf32> to vector<16x128xbf16>
    %c0_41 = arith.constant 0 : index
    %c0_42 = arith.constant 0 : index
    %83 = vector.load %arg15[%c0_41, %c0_42] : memref<128x128xbf16, #tpu.memory_space<vmem>>, vector<128x128xbf16>
    %cst_43 = arith.constant dense<0.000000e+00> : vector<16x128xf32>
    %84 = tpu.matmul %82, %83, %cst_43 {dimension_numbers = #tpu.dot_dimension_numbers<[1], [0], [0], [1], [0, 0, 1, 1], [], []>} : vector<16x128xbf16>, vector<128x128xbf16>, vector<16x128xf32> -> vector<16x128xf32>
    %c0_44 = arith.constant 0 : index
    %c0_45 = arith.constant 0 : index
    %85 = vector.load %arg16[%c0_44, %c0_45] : memref<1x128xf32, #tpu.memory_space<vmem>>, vector<1x128xf32>
    %86 = vector.broadcast %85 : vector<1x128xf32> to vector<16x128xf32>
    %87 = arith.addf %84, %86 : vector<16x128xf32>
    %cst_46 = arith.constant 0.000000e+00 : f32
    %88 = vector.broadcast %cst_46 : f32 to vector<16x128xf32>
    %89 = arith.maximumf %87, %88 : vector<16x128xf32>
    %90 = arith.truncf %89 : vector<16x128xf32> to vector<16x128xbf16>
    %cst_47 = arith.constant dense<0.000000e+00> : vector<32x128xf32>
    %91 = tpu.matmul %10, %90, %cst_47 {dimension_numbers = #tpu.dot_dimension_numbers<[1], [0], [0], [1], [0, 0, 1, 1], [], []>} : vector<32x16xbf16>, vector<16x128xbf16>, vector<32x128xf32> -> vector<32x128xf32>
    %92 = arith.mulf %91, %26 : vector<32x128xf32>
    %93 = arith.truncf %92 : vector<32x128xf32> to vector<32x128xbf16>
    %cst_48 = arith.constant dense<0.000000e+00> : vector<16x128xf32>
    %94 = tpu.matmul %16, %93, %cst_48 {dimension_numbers = #tpu.dot_dimension_numbers<[1], [0], [0], [1], [0, 0, 1, 1], [], []>} : vector<16x32xbf16>, vector<32x128xbf16>, vector<16x128xf32> -> vector<16x128xf32>
    %95 = arith.truncf %94 : vector<16x128xf32> to vector<16x128xbf16>
    %96 = tpu.concatenate %90, %95 in 1 : vector<16x128xbf16>, vector<16x128xbf16> -> vector<16x256xbf16>
    %c0_49 = arith.constant 0 : index
    %c0_50 = arith.constant 0 : index
    %97 = vector.load %arg17[%c0_49, %c0_50] : memref<256x128xbf16, #tpu.memory_space<vmem>>, vector<256x128xbf16>
    %cst_51 = arith.constant dense<0.000000e+00> : vector<16x128xf32>
    %98 = tpu.matmul %96, %97, %cst_51 {dimension_numbers = #tpu.dot_dimension_numbers<[1], [0], [0], [1], [0, 0, 1, 1], [], []>} : vector<16x256xbf16>, vector<256x128xbf16>, vector<16x128xf32> -> vector<16x128xf32>
    %c0_52 = arith.constant 0 : index
    %c0_53 = arith.constant 0 : index
    %99 = vector.load %arg18[%c0_52, %c0_53] : memref<1x128xf32, #tpu.memory_space<vmem>>, vector<1x128xf32>
    %100 = vector.broadcast %99 : vector<1x128xf32> to vector<16x128xf32>
    %101 = arith.addf %98, %100 : vector<16x128xf32>
    %cst_54 = arith.constant 0.000000e+00 : f32
    %102 = vector.broadcast %cst_54 : f32 to vector<16x128xf32>
    %103 = arith.maximumf %101, %102 : vector<16x128xf32>
    %104 = vector.broadcast %74 : f32 to vector<16x128xf32>
    %105 = arith.mulf %49, %104 : vector<16x128xf32>
    %106 = vector.broadcast %75 : f32 to vector<16x128xf32>
    %107 = arith.mulf %81, %106 : vector<16x128xf32>
    %108 = arith.addf %105, %107 : vector<16x128xf32>
    %109 = vector.broadcast %76 : f32 to vector<16x128xf32>
    %110 = arith.mulf %103, %109 : vector<16x128xf32>
    %111 = arith.addf %108, %110 : vector<16x128xf32>
    %112 = arith.truncf %111 : vector<16x128xf32> to vector<16x128xbf16>
    %c0_55 = arith.constant 0 : index
    %c0_56 = arith.constant 0 : index
    %113 = vector.load %arg19[%c0_55, %c0_56] : memref<128x128xbf16, #tpu.memory_space<vmem>>, vector<128x128xbf16>
    %cst_57 = arith.constant dense<0.000000e+00> : vector<16x128xf32>
    %114 = tpu.matmul %112, %113, %cst_57 {dimension_numbers = #tpu.dot_dimension_numbers<[1], [0], [0], [1], [0, 0, 1, 1], [], []>} : vector<16x128xbf16>, vector<128x128xbf16>, vector<16x128xf32> -> vector<16x128xf32>
    %c0_58 = arith.constant 0 : index
    %c0_59 = arith.constant 0 : index
    %115 = vector.load %arg20[%c0_58, %c0_59] : memref<1x128xf32, #tpu.memory_space<vmem>>, vector<1x128xf32>
    %116 = vector.broadcast %115 : vector<1x128xf32> to vector<16x128xf32>
    %117 = arith.addf %114, %116 : vector<16x128xf32>
    %cst_60 = arith.constant 0.000000e+00 : f32
    %118 = vector.broadcast %cst_60 : f32 to vector<16x128xf32>
    %119 = arith.maximumf %117, %118 : vector<16x128xf32>
    %120 = arith.truncf %119 : vector<16x128xf32> to vector<16x128xbf16>
    %cst_61 = arith.constant dense<0.000000e+00> : vector<32x128xf32>
    %121 = tpu.matmul %10, %120, %cst_61 {dimension_numbers = #tpu.dot_dimension_numbers<[1], [0], [0], [1], [0, 0, 1, 1], [], []>} : vector<32x16xbf16>, vector<16x128xbf16>, vector<32x128xf32> -> vector<32x128xf32>
    %122 = arith.mulf %121, %27 : vector<32x128xf32>
    %123 = arith.truncf %122 : vector<32x128xf32> to vector<32x128xbf16>
    %cst_62 = arith.constant dense<0.000000e+00> : vector<16x128xf32>
    %124 = tpu.matmul %16, %123, %cst_62 {dimension_numbers = #tpu.dot_dimension_numbers<[1], [0], [0], [1], [0, 0, 1, 1], [], []>} : vector<16x32xbf16>, vector<32x128xbf16>, vector<16x128xf32> -> vector<16x128xf32>
    %125 = arith.truncf %124 : vector<16x128xf32> to vector<16x128xbf16>
    %126 = tpu.concatenate %120, %125 in 1 : vector<16x128xbf16>, vector<16x128xbf16> -> vector<16x256xbf16>
    %c0_63 = arith.constant 0 : index
    %c0_64 = arith.constant 0 : index
    %127 = vector.load %arg21[%c0_63, %c0_64] : memref<256x128xbf16, #tpu.memory_space<vmem>>, vector<256x128xbf16>
    %cst_65 = arith.constant dense<0.000000e+00> : vector<16x128xf32>
    %128 = tpu.matmul %126, %127, %cst_65 {dimension_numbers = #tpu.dot_dimension_numbers<[1], [0], [0], [1], [0, 0, 1, 1], [], []>} : vector<16x256xbf16>, vector<256x128xbf16>, vector<16x128xf32> -> vector<16x128xf32>
    %c0_66 = arith.constant 0 : index
    %c0_67 = arith.constant 0 : index
    %129 = vector.load %arg22[%c0_66, %c0_67] : memref<1x128xf32, #tpu.memory_space<vmem>>, vector<1x128xf32>
    %130 = vector.broadcast %129 : vector<1x128xf32> to vector<16x128xf32>
    %131 = arith.addf %128, %130 : vector<16x128xf32>
    %cst_68 = arith.constant 0.000000e+00 : f32
    %132 = vector.broadcast %cst_68 : f32 to vector<16x128xf32>
    %133 = arith.maximumf %131, %132 : vector<16x128xf32>
    %c0_69 = arith.constant 0 : index
    %c0_70 = arith.constant 0 : index
    %134 = vector.load %arg23[%c0_69, %c0_70] : memref<16x128xf32, #tpu.memory_space<vmem>>, vector<16x128xf32>
    tpu.vector_store %arg23[%c0_69, %c0_70], %133 {strides = array<i32>} : memref<16x128xf32, #tpu.memory_space<vmem>>, vector<16x128xf32>,
    return
  }
}

</mosaic_0001>

<bundles_post_ra>
// kernel: tpu_custom_call.1
= control target key start
LH: loop header
LB: loop body
LE: loop exit
PB: predicated region body
PF: predicated region fallthrough
CT: control target
= control target key end

     0   :  { %s3452_s0 = inlined_call_operand.vmem [shape: f32[16,8], index: 0, kind: input, shape index: {}]   ;;  %s3453_s1 = inlined_call_operand.vmem [shape: f32[32,4], index: 1, kind: input, shape index: {}]   ;;  %s3454_s2 = inlined_call_operand.vmem [shape: s32[32,1], index: 2, kind: input, shape index: {}]   ;;  %s3455_s3 = inlined_call_operand.vmem [shape: s32[1,32], index: 3, kind: input, shape index: {}]   ;;  %s3456_s4 = inlined_call_operand.vmem [shape: f32[5], index: 4, kind: input, shape index: {}]   ;;  %s3457_s5 = inlined_call_operand.hbm [shape: bf16[4,512], index: 5, kind: input, shape index: {}]   ;;  %s3458_s6 = inlined_call_operand.hbm [shape: f32[1,512], index: 6, kind: input, shape index: {}]   ;;  %s3459_s7 = inlined_call_operand.hbm [shape: bf16[8,128], index: 7, kind: input, shape index: {}]   ;;  %s3460_s8 = inlined_call_operand.vmem [shape: f32[1,128], index: 8, kind: input, shape index: {}]   ;;  %s3461_s9 = inlined_call_operand.hbm [shape: bf16[256,128], index: 9, kind: input, shape index: {}]   ;;  %s3462_s10 = inlined_call_operand.hbm [shape: f32[1,128], index: 10, kind: input, shape index: {}]   ;;  %s3463_s11 = inlined_call_operand.hbm [shape: bf16[128,128], index: 11, kind: input, shape index: {}]   ;;  %s3464_s12 = inlined_call_operand.hbm [shape: f32[1,128], index: 12, kind: input, shape index: {}]   ;;  %s3465_s13 = inlined_call_operand.hbm [shape: bf16[256,128], index: 13, kind: input, shape index: {}]   ;;  %s3466_s14 = inlined_call_operand.hbm [shape: f32[1,128], index: 14, kind: input, shape index: {}]   ;;  %s3467_s15 = inlined_call_operand.hbm [shape: bf16[128,128], index: 15, kind: input, shape index: {}]   ;;  %s3468_s16 = inlined_call_operand.hbm [shape: f32[1,128], index: 16, kind: input, shape index: {}]   ;;  %s3469_s17 = inlined_call_operand.hbm [shape: bf16[256,128], index: 17, kind: input, shape index: {}]   ;;  %s3470_s18 = inlined_call_operand.hbm [shape: f32[1,128], index: 18, kind: input, shape index: {}]   ;;  %s3471_s19 = inlined_call_operand.hbm [shape: bf16[128,128], index: 19, kind: input, shape index: {}]   ;;  %s3472_s20 = inlined_call_operand.hbm [shape: f32[1,128], index: 20, kind: input, shape index: {}]   ;;  %s3473_s21 = inlined_call_operand.vmem [shape: bf16[256,128], index: 21, kind: input, shape index: {}]   ;;  %s3474_s22 = inlined_call_operand.vmem [shape: f32[1,128], index: 22, kind: input, shape index: {}]   ;;  %s3475_s23 = inlined_call_operand.hbm [shape: f32[16,128], index: 23, kind: output, shape index: {}]  }
   0x1   :  { %3479 = sst [smem:[#allocation39_spill]] %s3452_s0 }
   0x2   :  { %3480 = sst [smem:[#allocation40_spill]] %s3453_s1 }
   0x3   :  { %3481 = sst [smem:[#allocation41_spill]] %s3454_s2 }
   0x4   :  { %3482 = sst [smem:[#allocation42_spill]] %s3455_s3 }
   0x5   :  { %3483 = sst [smem:[#allocation43_spill]] %s3456_s4 }
   0x6   :  { %3484 = sst [smem:[#allocation44_spill]] %s3457_s5 }
   0x7   :  { %3485 = sst [smem:[#allocation45_spill]] %s3458_s6 }
   0x8   :  { %3486 = sst [smem:[#allocation46_spill]] %s3459_s7 }
   0x9   :  { %28 = vsyncpa [#allocation5], 0 }
   0xa   :  { %29 = vsyncpa [#allocation3], 0 }
   0xb   :  { %30 = vsyncpa [#allocation8], 0 }
   0xc   :  { %31 = vsyncpa [#allocation11], 0 }
   0xd   :  { %32 = vsyncpa [#allocation14], 0 }
   0xe   :  { %33 = vsyncpa [#allocation17], 0 }
   0xf   :  { %34 = vsyncpa [#allocation20], 0 }
  0x10   :  { %35 = vsyncpa [#allocation23], 0 }
  0x11   :  { %36 = vsyncpa [#allocation26], 0 }
  0x12   :  { %37 = vsyncpa [#allocation4], 0  ;;  %s2942_s4 = smov [#allocation7]   ;;  %s2943_s24 = smov [#allocation10]  }
  0x13   :  { %s72_s30 = sshll.u32 %s2942_s4, 4  ;;  %s93_s25 = sshll.u32 %s2943_s24, 4  ;;  %s73_s30 = int_to_ptr.vmem [resolvable:$true] %s72_s30  ;;  %s94_s25 = int_to_ptr.vmem [resolvable:$true] %s93_s25 }
  0x14   :  { %s2598_s5 = scalar_lea.vmem %s73_s30, 64  ;;  %p2603_p1 = scmp.lt.s32.totalorder %s73_s30, %s73_s30 }
  0x15   :  { %p2599_p0 = scmp.ne.s32.totalorder %s73_s30, %s2598_s5  ;;  %p2604_p2 = scmp.lt.s32.totalorder %s2598_s5, %s2598_s5 }
  0x17   :  { %p2605_p3 = por %p2604_p2, %p2603_p1 }
  0x19   :  { %p2606_p4 = pnand %p2605_p3, %p2599_p0 }
  0x1b   :  { %2609 = shalt.err (!%p2606_p4)
}
  0x1c   :  { %s3487_s2 = sld [smem:[#allocation45_spill]]  ;;  %s2618_s6 = scalar_lea.vmem %s94_s25, 2048 }
  0x1d   :  { %p2619_p5 = scmp.ne.s32.totalorder %s94_s25, %s2618_s6  ;;  %p2623_p6 = scmp.lt.s32.totalorder %s94_s25, %s94_s25 }
  0x1e   :  { %p2624_p7 = scmp.lt.s32.totalorder %s2618_s6, %s2618_s6 }
  0x20   :  { %p2625_p8 = por %p2624_p7, %p2623_p6 }
  0x22   :  { %75 = dma.hbm_to_vmem [thread:$0]  %s3487_s2, 64, %s73_s30, [#allocation8]  }
  0x23   :  { %p2626_p9 = pnand %p2625_p8, %p2619_p5 }
  0x25   :  { %2629 = shalt.err (!%p2626_p9)
}
  0x26   :  { %s2944_s27 = smov 64   ;;  %s2945_s7 = smov 4  }
  0x27   :  { %99 = dma.hbm_to_vmem [thread:$0]  %s3461_s9, 2048, %s94_s25, [#allocation11], %s2944_s27, %s2944_s27, %s2945_s7  }
  0x28   :  { %s2946_s3 = smov [#allocation13]   ;;  %s2947_s4 = smov [#allocation16]  }
  0x29   :  { %s115_s0 = sshll.u32 %s2946_s3, 4  ;;  %s137_s30 = sshll.u32 %s2947_s4, 4  ;;  %s116_s0 = int_to_ptr.vmem [resolvable:$true] %s115_s0  ;;  %s138_s30 = int_to_ptr.vmem [resolvable:$true] %s137_s30 }
  0x2a   :  { %s2638_s24 = scalar_lea.vmem %s116_s0, 1024  ;;  %p2643_p11 = scmp.lt.s32.totalorder %s116_s0, %s116_s0 }
  0x2b   :  { %p2639_p10 = scmp.ne.s32.totalorder %s116_s0, %s2638_s24  ;;  %p2644_p12 = scmp.lt.s32.totalorder %s2638_s24, %s2638_s24 }
  0x2d   :  { %p2645_p13 = por %p2644_p12, %p2643_p11 }
  0x2f   :  { %p2646_p0 = pnand %p2645_p13, %p2639_p10 }
  0x31   :  { %2649 = shalt.err (!%p2646_p0)
}
  0x32   :  { %121 = dma.hbm_to_vmem [thread:$0]  %s3463_s11, 1024, %s116_s0, [#allocation14], %s2944_s27, %s2944_s27, %s2945_s7  }
  0x33   :  { %s2658_s9 = scalar_lea.vmem %s138_s30, 2048  ;;  %p2663_p2 = scmp.lt.s32.totalorder %s138_s30, %s138_s30 }
  0x34   :  { %p2659_p1 = scmp.ne.s32.totalorder %s138_s30, %s2658_s9  ;;  %p2664_p3 = scmp.lt.s32.totalorder %s2658_s9, %s2658_s9 }
  0x36   :  { %p2665_p4 = por %p2664_p3, %p2663_p2 }
  0x38   :  { %p2666_p5 = pnand %p2665_p4, %p2659_p1 }
  0x3a   :  { %2669 = shalt.err (!%p2666_p5)
}
  0x3b   :  { %143 = dma.hbm_to_vmem [thread:$0]  %s3465_s13, 2048, %s138_s30, [#allocation17], %s2944_s27, %s2944_s27, %s2945_s7  }
  0x3c   :  { %s2948_s2 = smov [#allocation19]   ;;  %s2949_s28 = smov [#allocation22]  }
  0x3d   :  { %s159_s6 = sshll.u32 %s2948_s2, 4  ;;  %s181_s29 = sshll.u32 %s2949_s28, 4  ;;  %s160_s6 = int_to_ptr.vmem [resolvable:$true] %s159_s6  ;;  %s182_s29 = int_to_ptr.vmem [resolvable:$true] %s181_s29 }
  0x3e   :  { %s2678_s11 = scalar_lea.vmem %s160_s6, 1024  ;;  %p2683_p7 = scmp.lt.s32.totalorder %s160_s6, %s160_s6 }
  0x3f   :  { %p2679_p6 = scmp.ne.s32.totalorder %s160_s6, %s2678_s11  ;;  %p2684_p8 = scmp.lt.s32.totalorder %s2678_s11, %s2678_s11 }
  0x41   :  { %p2685_p9 = por %p2684_p8, %p2683_p7 }
  0x43   :  { %p2686_p10 = pnand %p2685_p9, %p2679_p6 }
  0x45   :  { %2689 = shalt.err (!%p2686_p10)
}
  0x46   :  { %165 = dma.hbm_to_vmem [thread:$0]  %s3467_s15, 1024, %s160_s6, [#allocation20], %s2944_s27, %s2944_s27, %s2945_s7  }
  0x47   :  { %s2698_s13 = scalar_lea.vmem %s182_s29, 2048  ;;  %p2703_p12 = scmp.lt.s32.totalorder %s182_s29, %s182_s29 }
  0x48   :  { %p2699_p11 = scmp.ne.s32.totalorder %s182_s29, %s2698_s13  ;;  %p2704_p13 = scmp.lt.s32.totalorder %s2698_s13, %s2698_s13 }
  0x4a   :  { %p2705_p0 = por %p2704_p13, %p2703_p12 }
  0x4c   :  { %p2706_p1 = pnand %p2705_p0, %p2699_p11 }
  0x4e   :  { %2709 = shalt.err (!%p2706_p1)
}
  0x4f   :  { %187 = dma.hbm_to_vmem [thread:$0]  %s3469_s17, 2048, %s182_s29, [#allocation23], %s2944_s27, %s2944_s27, %s2945_s7  }
  0x50   :  { %s3488_s1 = sld [smem:[#allocation43_spill]]  ;;  %s2950_s25 = smov [#allocation25]  }
  0x51   :  { %s203_s15 = sshll.u32 %s2950_s25, 4  ;;  %s204_s15 = int_to_ptr.vmem [resolvable:$true] %s203_s15 }
  0x52   :  { %s2718_s26 = scalar_lea.vmem %s204_s15, 1024  ;;  %p2723_p3 = scmp.lt.s32.totalorder %s204_s15, %s204_s15 }
  0x53   :  { %p2719_p2 = scmp.ne.s32.totalorder %s204_s15, %s2718_s26  ;;  %p2724_p4 = scmp.lt.s32.totalorder %s2718_s26, %s2718_s26 }
  0x55   :  { %p2725_p5 = por %p2724_p4, %p2723_p3 }
  0x56   :  { %s52_s9 = sshll.u32 %s3488_s1, 4  ;;  %s53_s9 = int_to_ptr.vmem [resolvable:$true] %s52_s9 }
  0x57   :  { %p2726_p6 = pnand %p2725_p5, %p2719_p2 }
  0x59   :  { %2729 = shalt.err (!%p2726_p6)
}
  0x5a   :  { %209 = dma.hbm_to_vmem [thread:$0]  %s3471_s19, 1024, %s204_s15, [#allocation26], %s2944_s27, %s2944_s27, %s2945_s7  }
  0x5b   :  { %s2730_s6 = scalar_lea.vmem %s53_s9, 16  ;;  %p2735_p8 = scmp.lt.s32.totalorder %s53_s9, %s53_s9 }
  0x5c   :  { %p2731_p7 = scmp.ne.s32.totalorder %s53_s9, %s2730_s6  ;;  %p2736_p9 = scmp.lt.s32.totalorder %s2730_s6, %s2730_s6 }
  0x5e   :  { %p2737_p10 = por %p2736_p9, %p2735_p8 }
  0x60   :  { %p2738_p11 = pnand %p2737_p10, %p2731_p7 }
  0x62   :  { %2741 = shalt.err (!%p2738_p11)
}
  0x63   :  { %s2951_s28 = smov [#allocation2]   ;;  %s2952_s29 = smov [#allocation6]  }
  0x64   :  { %55 = dma.vmem_to_smem %s53_s9, 16, %s2951_s28, [#allocation5]  }
  0x65   :  { %s62_s11 = sshll.u32 %s2952_s29, 4  ;;  %s2953_s3 = smov [#allocation9]   ;;  %s63_s11 = int_to_ptr.vmem [resolvable:$true] %s62_s11 }
  0x66   :  { %s82_s0 = sshll.u32 %s2953_s3, 4  ;;  %s2750_s13 = scalar_lea.vmem %s63_s11, 128  ;;  %s83_s0 = int_to_ptr.vmem [resolvable:$true] %s82_s0 }
  0x67   :  { %p2751_p12 = scmp.ne.s32.totalorder %s63_s11, %s2750_s13  ;;  %p2755_p13 = scmp.lt.s32.totalorder %s63_s11, %s63_s11 }
  0x68   :  { %p2756_p0 = scmp.lt.s32.totalorder %s2750_s13, %s2750_s13 }
  0x6a   :  { %p2757_p1 = por %p2756_p0, %p2755_p13 }
  0x6c   :  { %p2758_p2 = pnand %p2757_p1, %p2751_p12 }
  0x6e   :  { %2761 = shalt.err (!%p2758_p2)
}
  0x6f   :  { %s3489_s7 = sld [smem:[#allocation44_spill]]  ;;  %s2770_s4 = scalar_lea.vmem %s83_s0, 64 }
  0x70   :  { %p2771_p3 = scmp.ne.s32.totalorder %s83_s0, %s2770_s4  ;;  %p2775_p4 = scmp.lt.s32.totalorder %s83_s0, %s83_s0 }
  0x71   :  { %p2776_p5 = scmp.lt.s32.totalorder %s2770_s4, %s2770_s4 }
  0x73   :  { %p2777_p6 = por %p2776_p5, %p2775_p4 }
  0x75   :  { %65 = dma.hbm_to_vmem [thread:$0]  %s3489_s7, 128, %s63_s11, [#allocation3]  }
  0x76   :  { %p2778_p7 = pnand %p2777_p6, %p2771_p3 }
  0x78   :  { %2781 = shalt.err (!%p2778_p7)
}
  0x79   :  { %s3490_s5 = sld [smem:[#allocation46_spill]]  ;;  %s2954_s1 = smov [#allocation12]  }
  0x7a   :  { %s106_s9 = sshll.u32 %s2954_s1, 4  ;;  %s2955_s25 = smov [#allocation15]   ;;  %s107_s9 = int_to_ptr.vmem [resolvable:$true] %s106_s9 }
  0x7b   :  { %s128_s15 = sshll.u32 %s2955_s25, 4  ;;  %s2790_s26 = scalar_lea.vmem %s107_s9, 16  ;;  %s129_s15 = int_to_ptr.vmem [resolvable:$true] %s128_s15 }
  0x7c   :  { %p2791_p8 = scmp.ne.s32.totalorder %s107_s9, %s2790_s26  ;;  %s2794_s2 = scalar_lea.vmem %s107_s9, 32 }
  0x7d   :  { %p2795_p9 = scmp.lt.s32.totalorder %s107_s9, %s107_s9  ;;  %p2796_p10 = scmp.lt.s32.totalorder %s2794_s2, %s2790_s26 }
  0x7f   :  { %85 = dma.hbm_to_vmem [thread:$0]  %s3490_s5, 64, %s83_s0, [#allocation8]  }
  0x80   :  { %p2797_p11 = por %p2796_p10, %p2795_p9 }
  0x82   :  { %p2798_p12 = pnand %p2797_p11, %p2791_p8 }
  0x84   :  { %2801 = shalt.err (!%p2798_p12)
}
  0x85   :  { %109 = dma.hbm_to_vmem [thread:$0]  %s3462_s10, 16, %s107_s9, [#allocation11]  }
  0x86   :  { %s2810_s28 = scalar_lea.vmem %s129_s15, 16  ;;  %s2814_s29 = scalar_lea.vmem %s129_s15, 32 }
  0x87   :  { %p2811_p13 = scmp.ne.s32.totalorder %s129_s15, %s2810_s28  ;;  %p2815_p0 = scmp.lt.s32.totalorder %s129_s15, %s129_s15 }
  0x88   :  { %p2816_p1 = scmp.lt.s32.totalorder %s2814_s29, %s2810_s28 }
  0x8a   :  { %p2817_p2 = por %p2816_p1, %p2815_p0 }
  0x8c   :  { %p2818_p3 = pnand %p2817_p2, %p2811_p13 }
  0x8e   :  { %2821 = shalt.err (!%p2818_p3)
}
  0x8f   :  { %131 = dma.hbm_to_vmem [thread:$0]  %s3464_s12, 16, %s129_s15, [#allocation14]  }
  0x90   :  { %s2956_s0 = smov [#allocation18]   ;;  %s2957_s19 = smov [#allocation21]  }
  0x91   :  { %s150_s13 = sshll.u32 %s2956_s0, 4  ;;  %s172_s27 = sshll.u32 %s2957_s19, 4  ;;  %s151_s13 = int_to_ptr.vmem [resolvable:$true] %s150_s13  ;;  %s173_s27 = int_to_ptr.vmem [resolvable:$true] %s172_s27 }
  0x92   :  { %s2830_s7 = scalar_lea.vmem %s151_s13, 16  ;;  %s2834_s10 = scalar_lea.vmem %s151_s13, 32 }
  0x93   :  { %p2831_p4 = scmp.ne.s32.totalorder %s151_s13, %s2830_s7  ;;  %p2835_p5 = scmp.lt.s32.totalorder %s151_s13, %s151_s13 }
  0x94   :  { %p2836_p6 = scmp.lt.s32.totalorder %s2834_s10, %s2830_s7 }
  0x96   :  { %p2837_p7 = por %p2836_p6, %p2835_p5 }
  0x98   :  { %p2838_p8 = pnand %p2837_p7, %p2831_p4 }
  0x9a   :  { %2841 = shalt.err (!%p2838_p8)
}
  0x9b   :  { %153 = dma.hbm_to_vmem [thread:$0]  %s3466_s14, 16, %s151_s13, [#allocation17]  }
  0x9c   :  { %s2850_s24 = scalar_lea.vmem %s173_s27, 16  ;;  %s2854_s12 = scalar_lea.vmem %s173_s27, 32 }
  0x9d   :  { %p2851_p9 = scmp.ne.s32.totalorder %s173_s27, %s2850_s24  ;;  %p2855_p10 = scmp.lt.s32.totalorder %s173_s27, %s173_s27 }
  0x9e   :  { %p2856_p11 = scmp.lt.s32.totalorder %s2854_s12, %s2850_s24 }
  0xa0   :  { %p2857_p12 = por %p2856_p11, %p2855_p10 }
  0xa2   :  { %p2858_p13 = pnand %p2857_p12, %p2851_p9 }
  0xa4   :  { %2861 = shalt.err (!%p2858_p13)
}
  0xa5   :  { %175 = dma.hbm_to_vmem [thread:$0]  %s3468_s16, 16, %s173_s27, [#allocation20]  }
  0xa6   :  { %s2958_s9 = smov [#allocation24]   ;;  %s2959_s15 = smov [#allocation27]  }
  0xa7   :  { %s194_s25 = sshll.u32 %s2958_s9, 4  ;;  %s216_s26 = sshll.u32 %s2959_s15, 4  ;;  %s195_s25 = int_to_ptr.vmem [resolvable:$true] %s194_s25  ;;  %s217_s26 = int_to_ptr.vmem [resolvable:$true] %s216_s26 }
  0xa8   :  { %s2870_s2 = scalar_lea.vmem %s195_s25, 16  ;;  %s2874_s14 = scalar_lea.vmem %s195_s25, 32 }
  0xa9   :  { %p2871_p0 = scmp.ne.s32.totalorder %s195_s25, %s2870_s2  ;;  %p2875_p1 = scmp.lt.s32.totalorder %s195_s25, %s195_s25 }
  0xaa   :  { %p2876_p2 = scmp.lt.s32.totalorder %s2874_s14, %s2870_s2 }
  0xac   :  { %p2877_p3 = por %p2876_p2, %p2875_p1 }
  0xae   :  { %p2878_p4 = pnand %p2877_p3, %p2871_p0 }
  0xb0   :  { %2881 = shalt.err (!%p2878_p4)
}
  0xb1   :  { %197 = dma.hbm_to_vmem [thread:$0]  %s3470_s18, 16, %s195_s25, [#allocation23]  }
  0xb2   :  { %s2890_s28 = scalar_lea.vmem %s217_s26, 16  ;;  %s2894_s16 = scalar_lea.vmem %s217_s26, 32 }
  0xb3   :  { %p2891_p5 = scmp.ne.s32.totalorder %s217_s26, %s2890_s28  ;;  %p2895_p6 = scmp.lt.s32.totalorder %s217_s26, %s217_s26 }
  0xb4   :  { %p2896_p7 = scmp.lt.s32.totalorder %s2894_s16, %s2890_s28 }
  0xb6   :  { %p2897_p8 = por %p2896_p7, %p2895_p6 }
  0xb8   :  { %p2898_p9 = pnand %p2897_p8, %p2891_p5 }
  0xba   :  { %2901 = shalt.err (!%p2898_p9)
}
  0xbb   :  { %219 = dma.hbm_to_vmem [thread:$0]  %s3472_s20, 16, %s217_s26, [#allocation26]  }
  0xbc   :  { %2922 = dma.done.wait [#allocation5], 16  }
  0xbd   :  { %2923 = vsyncadd [#allocation5], 4294967280 }
  0xbe   :  { %2924 = dma.done.wait [#allocation3], 128  }
  0xbf   :  { %2925 = vsyncadd [#allocation3], 4294967168 }
  0xc0   :  { %2926 = dma.done.wait [#allocation8], 128  }
  0xc1   :  { %2927 = vsyncadd [#allocation8], 4294967168 }
  0xc2   :  { %2928 = dma.done.wait [#allocation11], 2064  }
  0xc3   :  { %2929 = vsyncadd [#allocation11], 4294965232 }
  0xc4   :  { %2930 = dma.done.wait [#allocation14], 1040  }
  0xc5   :  { %2931 = vsyncadd [#allocation14], 4294966256 }
  0xc6   :  { %2932 = dma.done.wait [#allocation17], 2064  }
  0xc7   :  { %2933 = vsyncadd [#allocation17], 4294965232 }
  0xc8   :  { %2934 = dma.done.wait [#allocation20], 1040  }
  0xc9   :  { %2935 = vsyncadd [#allocation20], 4294966256 }
  0xca   :  { %2936 = dma.done.wait [#allocation23], 2064  }
  0xcb   :  { %2937 = vsyncadd [#allocation23], 4294965232 }
  0xcc   :  { %2938 = dma.done.wait [#allocation26], 1040  }
  0xcd   :  { %2939 = vsyncadd [#allocation26], 4294966256 }
  0xce   :  { %272 = sfence }
  0xcf   :  { %v287_v0 = vlaneseq  ;;  %v2960_v1 = vmov 1983009808   ;;  %v2961_v3 = vmov 0   ;;  %v3159_v5 = vld [vmem:[#allocation6] sm:$0xff]  ;;  %vm377_vm0 = vcmask 1041408   ;;  %s3491_s3 = sld [smem:[#allocation41_spill]] }
  0xd0   :  { %v355_v2 = vunpack.c.l.s4 %v2960_v1  ;;  %422 = vmatprep.mubr.bf16.mxu0 %v2961_v3  ;;  %2499 = vset.pattern.permute.xlu0 %v2961_v3  ;;  %vm370_vm1 = vcmask 31744   ;;  %v513_v9 = vld [vmem:[#allocation9] sm:$0xf]  ;;  %vm525_vm2 = vcmask 1043456   ;;  %s3492_s24 = sld [smem:[#allocation40_spill]]  ;;  %v2962_v20 = vmov 0.0  }
  0xd1   :  { %v3155_v4 = vshrl.u32 %v287_v0, 7  ;;  %2500 = vset.pattern.permute.xlu1 %v2961_v3  ;;  %475 = vmatprep.mubr.bf16.mxu1 %v2961_v3  ;;  %v527_v18 = vsel %vm525_vm2, %v513_v9, 0  ;;  %vm521_vm3 = vcmask 64512   ;;  %s3493_s14 = sld [smem:[#allocation39_spill]]  ;;  %vm2963_vm4 = vmmov 0   ;;  %v2502_v60 = vld [vmem:[#allocation10 + $0x78] sm:$0xff]  }
  0xd2   :  { %v356_v6 = vunpack.c.0.s8 %v355_v2  ;;  %v288_v27 = vand.u32 127, %v287_v0  ;;  %vm573_vm7 = vcmask 130048   ;;  %v2098_v42 = vld [vmem:[%s3460_s8] ss:$0 sm:$0xff]  ;;  %v353_v56 = vcombine.high %v3159_v5, %v3159_v5  ;;  %v2503_v61 = vld [vmem:[#allocation10 + $0x38] sm:$0xff]   ;;  %v2506_v0 = vld [vmem:[#allocation10 + $0x68] sm:$0xff]  }
  0xd3   :  { %v2504_v62 = vld [vmem:[#allocation10 + $0x70] sm:$0xff]   ;;  %v2507_v1 = vld [vmem:[#allocation10 + $0x28] sm:$0xff]   ;;  %v2508_v2 = vld [vmem:[#allocation10 + $0x60] sm:$0xff]   ;;  %s3494_s11 = sld [smem:[#allocation42_spill]]  ;;  %vm635_vm12 = vcmask 261120  }
  0xd4   :  { %v3174_v12 = vsub.s32 %v356_v6, %v3155_v4  ;;  %v2505_v63 = vld [vmem:[#allocation10 + $0x30] sm:$0xff]   ;;  %v2510_v6 = vld [vmem:[#allocation10 + $0x58] sm:$0xff]   ;;  %s1250_s18 = sld [smem:[#allocation2]] }
  0xd5   :  { %v282_v7 = vld [vmem:[%s3491_s3] sm:$0xff]  ;;  %v284_v8 = vld [vmem:[%s3491_s3 + $0x10] sm:$0xff]  ;;  %v283_v10 = vld [vmem:[%s3491_s3 + $0x8] sm:$0xff]  ;;  %s2149_s20 = sld [smem:[#allocation2 + $0x1]] }
  0xd6   :  { %290 = vperm.xlu0 %2499, %v282_v7   ;;  %296 = vperm.xlu1 %2500, %v284_v8   ;;  %v285_v11 = vld [vmem:[%s3491_s3 + $0x18] sm:$0xff]  ;;  %v276_v13 = vld [vmem:[%s3492_s24] sm:$0xff]  ;;  %v277_v14 = vld [vmem:[%s3492_s24 + $0x8] sm:$0xff]  ;;  %v360_v15 = vrot.slane %v3159_v5, %v3174_v12  ;;  %v367_v57 = vrot.slane %v353_v56, %v3174_v12  ;;  %s2150_s3 = sld [smem:[#allocation2 + $0x2]] }
  0xd7   :  { %v3186_v19 = vpack.c.bf16 %v277_v14, %v276_v13  ;;  %v278_v21 = vld [vmem:[%s3492_s24 + $0x10] sm:$0xff]  ;;  %v279_v22 = vld [vmem:[%s3492_s24 + $0x18] sm:$0xff]  ;;  %v274_v24 = vld [vmem:[%s3493_s14] sm:$0xff]  ;;  %s2151_s0 = sld [smem:[#allocation2 + $0x3]] }
  0xd8   :  { %v368_v16 = vcombine.high %v360_v15, %v360_v15  ;;  %v379_v17 = vsel %vm377_vm0, %v360_v15, 0  ;;  %v3198_v23 = vpack.c.bf16 %v279_v22, %v278_v21  ;;  %v275_v25 = vld [vmem:[%s3493_s14 + $0x8] sm:$0xff]  ;;  %v369_v58 = vcombine.high %v367_v57, %v367_v57  ;;  %v2509_v5 = vld [vmem:[#allocation10 + $0x20] sm:$0xff]   ;;  %v2512_v8 = vld [vmem:[#allocation10 + $0x50] sm:$0xff]   ;;  %s2152_s13 = sld [smem:[#allocation2 + $0x4]] }
  0xd9   :  { %v512_v26 = vpack.c.bf16 %v275_v25, %v274_v24  ;;  %v385_v59 = vsel %vm377_vm0, %v367_v57, 0  ;;  %v2511_v7 = vld [vmem:[#allocation10 + $0x18] sm:$0xff]   ;;  %v2513_v9 = vld [vmem:[#allocation10 + $0x10] sm:$0xff]  }
  0xda   :  { %293 = vperm.xlu0 %2499, %v283_v10   ;;  %299 = vperm.xlu1 %2500, %v285_v11   ;;  %v3255_v10 = vld [vmem:[#allocation7] sm:$0xf]  ;;  %v2089_v22 = vld [vmem:[%s3494_s11] ss:$0 sm:$0xff] }
  0xdb   :  { %2092 = vmatprep.subr.msk.bf16.mxu0 %vm377_vm0, %v368_v16  ;;  %2095 = vmatprep.subr.msk.bf16.mxu1 %vm377_vm0, %v369_v58  ;;  %vm322_vm10 = vcmp.eq.s32.totalorder %v3155_v4, %v2089_v22  ;;  %v2522_v56 = vld [vmem:[#allocation13 + $0x18] sm:$0xff]   ;;  %v2523_v57 = vld [vmem:[#allocation13 + $0x10] sm:$0xff]   ;;  %v2524_v58 = vld [vmem:[#allocation13 + $0x8] sm:$0xff]  }
  0xdc   :  { %405 = vmatpush1.bf16.msra.mxu0 %v379_v17  ;;  %458 = vmatpush1.bf16.msra.mxu1 %v385_v59  ;;  %v2525_v59 = vld [vmem:[#allocation13] sm:$0xff]  }
  0xdd   :  { %2352 = vmatprep.subr.bf16.mxu0 %v2962_v20  ;;  %2219 = vmatprep.subr.bf16.mxu1 %v2502_v60 }
  0xdf   :  { %2093 = vmatmul.mubr.msk.bf16.vlgmr.msra.gmra.mxu0 %vm370_vm1, %v3186_v19  ;;  %2096 = vmatmul.mubr.msk.bf16.vlgmr.msra.gmra.mxu1 %vm370_vm1, %v3186_v19 }
  0xe0   :  { %2353 = vmatpush3.bf16.msra.mxu0 %v527_v18  ;;  %432 = vmatprep.mubr.bf16.mxu0 %v2961_v3  ;;  %v317_v18 = vadd.s32 8, %v3155_v4 }
  0xe1   :  { %2220 = vmatpush3.bf16.msra.mxu1 %v2503_v61  ;;  %485 = vmatprep.mubr.bf16.mxu1 %v2961_v3  ;;  %v334_v3 = vsub.s32 0, %v3155_v4 }
  0xe2   :  { %2221 = vmatprep.subr.bf16.mxu1 %v2504_v62  ;;  %vm323_vm11 = vcmp.eq.s32.totalorder %v317_v18, %v2089_v22 }
  0xe3   :  { %v335_v11 = vrot.slane %v3255_v10, %v334_v3 }
  0xe5   :  { %2222 = vmatpush3.bf16.msra.mxu1 %v2505_v63 }
  0xe6   :  { %2223 = vmatprep.subr.bf16.mxu1 %v2506_v0 }
  0xe7   :  { %2094 = vmatmul.mubr.msk.bf16.gmra.mxu0 %vm370_vm1, %v3198_v23  ;;  %2097 = vmatmul.mubr.msk.bf16.gmra.mxu1 %vm370_vm1, %v3198_v23 }
  0xe8   :  { %2354 = vmatprep.mubr.msk.bf16.mxu0 %vm2963_vm4, %v2962_v20 }
  0xe9   :  { %2224 = vmatpush3.bf16.msra.mxu1 %v2507_v1 }
  0xea   :  { %2225 = vmatprep.subr.bf16.mxu1 %v2508_v2 }
  0xed   :  { %2226 = vmatpush3.bf16.msra.mxu1 %v2509_v5 }
  0xee   :  { %2227 = vmatprep.subr.bf16.mxu1 %v2510_v6 }
  0xef   :  { %2355 = vmatmul.mubr.msk.bf16.vlgmr.msra.gmra.mxu0 %vm521_vm3, %v512_v26 }
  0xf1   :  { %2228 = vmatpush3.bf16.msra.mxu1 %v2511_v7 }
  0xf2   :  { %2229 = vmatprep.subr.bf16.mxu1 %v2512_v8  ;;  %v2103_v8 = vld [vmem:[#allocation12] ss:$0 sm:$0xff] }
  0xf5   :  { %2230 = vmatpush3.bf16.msra.mxu1 %v2513_v9 }
 0x151   :  { %v291_v28 = vpop.permute.xlu0 %290  ;;  %v297_v41 = vpop.permute.xlu1 %296 }
 0x152   :  { %vm301_vm5 = vcmp.eq.s32.totalorder %v288_v27, %v291_v28  ;;  %vm303_vm8 = vcmp.eq.s32.totalorder %v288_v27, %v297_v41  ;;  %v2514_v41 = vld [vmem:[#allocation10 + $0x48] sm:$0xff]  }
 0x153   :  { %v2085_v29 = vsel %vm301_vm5, 1.0, %v2962_v20  ;;  %v2087_v53 = vsel %vm303_vm8, 1.0, %v2962_v20  ;;  %2231 = vmatprep.subr.bf16.mxu1 %v2514_v41  ;;  %v2533_v41 = vld [vmem:[#allocation16 + $0x20] sm:$0xff]  }
 0x155   :  { %v294_v30 = vpop.permute.xlu0 %293  ;;  %v300_v47 = vpop.permute.xlu1 %299 }
 0x156   :  { %vm302_vm6 = vcmp.eq.s32.totalorder %v288_v27, %v294_v30  ;;  %vm304_vm9 = vcmp.eq.s32.totalorder %v288_v27, %v300_v47  ;;  %v2520_v47 = vld [vmem:[#allocation13 + $0x28] sm:$0xff]  }
 0x157   :  { %v2086_v31 = vsel %vm302_vm6, 1.0, %v2962_v20  ;;  %v2088_v54 = vsel %vm304_vm9, 1.0, %v2962_v20 }
 0x158   :  { %v3212_v32 = vpack.c.bf16 %v2086_v31, %v2085_v29  ;;  %v3237_v55 = vpack.c.bf16 %v2088_v54, %v2087_v53 }
 0x15a   :  { %2360 = vmatprep.mubr.msk.bf16.mxu0 %vm573_vm7, %v3212_v32 }
 0x19f   :  { %v3216_v33 = vpop.f32.mrf.mxu0 }
 0x1a0   :  { %v425_v15 = vadd.f32 %v3216_v33, %v335_v11 }
 0x1a1   :  { %v3218_v34 = vpop.f32.mrf.mxu0 }
 0x1a2   :  { %v496_v24 = vmax.f32 %v425_v15, 0.0 }
 0x1a3   :  { %v3220_v35 = vpop.f32.mrf.mxu0 }
 0x1a4   :  { %v429_v16 = vadd.f32 %v3220_v35, %v335_v11  ;;  %v2090_v35 = vsel %vm322_vm10, 1.0, %v2962_v20 }
 0x1a5   :  { %v3222_v36 = vpop.f32.mrf.mxu0 }
 0x1a6   :  { %v500_v25 = vmax.f32 %v429_v16, 0.0 }
 0x1a7   :  { %v434_v37 = vpop.f32.mrf.mxu0 }
 0x1a8   :  { %v435_v12 = vadd.f32 %v434_v37, %v335_v11  ;;  %v2091_v37 = vsel %vm323_vm11, 1.0, %v2962_v20 }
 0x1a9   :  { %v3224_v38 = vpop.f32.mrf.mxu0 }
 0x1aa   :  { %v504_v19 = vmax.f32 %v435_v12, 0.0 }
 0x1ab   :  { %v438_v39 = vpop.f32.mrf.mxu0 }
 0x1ac   :  { %v439_v13 = vadd.f32 %v438_v39, %v335_v11  ;;  %v3268_v39 = vpack.c.bf16 %v2091_v37, %v2090_v35  ;;  %v2531_v35 = vld [vmem:[#allocation16 + $0x28] sm:$0xff]   ;;  %v2532_v37 = vld [vmem:[#allocation16 + $0x60] sm:$0xff]  }
 0x1ad   :  { %v3226_v40 = vpop.f32.mrf.mxu0 }
 0x1ae   :  { %v508_v21 = vmax.f32 %v439_v13, 0.0 }
 0x1af   :  { %v563_v43 = vpop.f32.mrf.mxu0 }
 0x1b0   :  { %v564_v45 = vadd.f32 %v2098_v42, %v563_v43  ;;  %v2516_v43 = vld [vmem:[#allocation10 + $0x40] sm:$0xff]  }
 0x1b1   :  { %v2356_v44 = vpop.f32.mrf.mxu0 }
 0x1b2   :  { %v570_v50 = vmax.f32 %v564_v45, 0.0  ;;  %v2517_v44 = vld [vmem:[#allocation10] sm:$0xff]  }
 0x1b3   :  { %v566_v46 = vpop.f32.mrf.mxu0  ;;  %v2518_v45 = vld [vmem:[#allocation13 + $0x38] sm:$0xff]  }
 0x1b4   :  { %v567_v48 = vadd.f32 %v2098_v42, %v566_v46  ;;  %v2515_v42 = vld [vmem:[#allocation10 + $0x8] sm:$0xff]   ;;  %v2519_v46 = vld [vmem:[#allocation13 + $0x30] sm:$0xff]  }
 0x1b5   :  { %v2357_v49 = vpop.f32.mrf.mxu0  ;;  %2232 = vmatpush3.bf16.msra.mxu1 %v2515_v42  ;;  %v2534_v42 = vld [vmem:[#allocation16 + $0x58] sm:$0xff]  }
 0x1b6   :  { %v571_v51 = vmax.f32 %v567_v48, 0.0  ;;  %2233 = vmatprep.subr.bf16.mxu1 %v2516_v43  ;;  %v2521_v48 = vld [vmem:[#allocation13 + $0x20] sm:$0xff]  }
 0x1b7   :  { %v2535_v43 = vld [vmem:[#allocation16 + $0x18] sm:$0xff]  }
 0x1b8   :  { %v3231_v52 = vpack.c.bf16 %v571_v51, %v570_v50 }
 0x1b9   :  { %2234 = vmatpush3.bf16.msra.mxu1 %v2517_v44  ;;  %v2536_v44 = vld [vmem:[#allocation16 + $0x50] sm:$0xff]  }
 0x1ba   :  { %2358 = vmatprep.subr.bf16.mxu0 %v3231_v52 }
 0x1bb   :  { %2359 = vmatpush3.bf16.msra.mxu0 %v3231_v52 }
 0x1bc   :  { %2364 = vmatprep.subr.bf16.mxu0 %v2962_v20 }
 0x1be   :  { %2361 = vmatmul.mubr.msk.bf16.vlgmr.msra.gmra.mxu0 %vm573_vm7, %v3237_v55 }
 0x1bf   :  { %2368 = vmatprep.mubr.msk.bf16.mxu0 %vm2963_vm4, %v2962_v20 }
 0x27e   :  { %v2362_v14 = vpop.f32.mrf.mxu0 }
 0x27f   :  { %v631_v26 = vmul.f32 %v2362_v14, %v504_v19 }
 0x280   :  { %v614_v17 = vpop.f32.mrf.mxu0 }
 0x281   :  { %v629_v29 = vmul.f32 %v614_v17, %v496_v24  ;;  %v2120_v17 = vld [vmem:[#allocation15] ss:$0 sm:$0xff] }
 0x282   :  { %v2363_v23 = vpop.f32.mrf.mxu0 }
 0x283   :  { %v632_v27 = vmul.f32 %v2363_v23, %v508_v21 }
 0x284   :  { %v617_v28 = vpop.f32.mrf.mxu0 }
 0x285   :  { %v634_v30 = vpack.c.bf16 %v632_v27, %v631_v26  ;;  %v630_v31 = vmul.f32 %v617_v28, %v500_v25  ;;  %v2526_v28 = vld [vmem:[#allocation16 + $0x78] sm:$0xff]  }
 0x287   :  { %v633_v33 = vpack.c.bf16 %v630_v31, %v629_v29  ;;  %2365 = vmatpush3.bf16.msra.mxu0 %v634_v30  ;;  %v2527_v29 = vld [vmem:[#allocation16 + $0x38] sm:$0xff]   ;;  %v2528_v30 = vld [vmem:[#allocation16 + $0x70] sm:$0xff]  }
 0x288   :  { %2366 = vmatprep.subr.bf16.mxu0 %v2962_v20  ;;  %v2529_v31 = vld [vmem:[#allocation16 + $0x30] sm:$0xff]  }
 0x28b   :  { %2367 = vmatpush3.bf16.msra.mxu0 %v633_v33  ;;  %v2530_v33 = vld [vmem:[#allocation16 + $0x68] sm:$0xff]  }
 0x28c   :  { %2372 = vmatprep.subr.bf16.mxu0 %v2962_v20 }
 0x28e   :  { %2369 = vmatmul.mubr.msk.bf16.vlgmr.msra.gmra.mxu0 %vm635_vm12, %v3268_v39 }
 0x28f   :  { %2388 = vmatprep.mubr.msk.bf16.mxu0 %vm2963_vm4, %v2962_v20  ;;  %2373 = vmatpush3.bf16.msra.mxu0 %v2518_v45  ;;  %v2537_v45 = vld [vmem:[#allocation16 + $0x10] sm:$0xff]  }
 0x290   :  { %2374 = vmatprep.subr.bf16.mxu0 %v2962_v20 }
 0x293   :  { %2375 = vmatpush3.bf16.msra.mxu0 %v2519_v46  ;;  %v338_v46 = vsub.s32 1, %v3155_v4 }
 0x294   :  { %2376 = vmatprep.subr.bf16.mxu0 %v2962_v20 }
 0x297   :  { %2377 = vmatpush3.bf16.msra.mxu0 %v2520_v47  ;;  %v339_v47 = vrot.slane %v3255_v10, %v338_v46 }
 0x298   :  { %2378 = vmatprep.subr.bf16.mxu0 %v2962_v20 }
 0x29b   :  { %2379 = vmatpush3.bf16.msra.mxu0 %v2521_v48  ;;  %v437_v48 = vadd.f32 %v3224_v38, %v339_v47 }
 0x29c   :  { %2380 = vmatprep.subr.bf16.mxu0 %v2962_v20 }
 0x29f   :  { %2381 = vmatpush3.bf16.msra.mxu0 %v2522_v56  ;;  %v505_v56 = vmax.f32 %v437_v48, 0.0 }
 0x2a0   :  { %2382 = vmatprep.subr.bf16.mxu0 %v2962_v20 }
 0x2a3   :  { %2383 = vmatpush3.bf16.msra.mxu0 %v2523_v57 }
 0x2a4   :  { %2384 = vmatprep.subr.bf16.mxu0 %v2962_v20 }
 0x2a7   :  { %2385 = vmatpush3.bf16.msra.mxu0 %v2524_v58 }
 0x2a8   :  { %2386 = vmatprep.subr.bf16.mxu0 %v2962_v20 }
 0x2ab   :  { %2387 = vmatpush3.bf16.msra.mxu0 %v2525_v59 }
 0x2ac   :  { %2398 = vmatprep.subr.bf16.mxu0 %v2962_v20 }
 0x34e   :  { %v673_v49 = vpop.f32.mrf.mxu0 }
 0x350   :  { %v2370_v50 = vpop.f32.mrf.mxu0 }
 0x352   :  { %v676_v51 = vpop.f32.mrf.mxu0 }
 0x353   :  { %v680_v53 = vpack.c.bf16 %v676_v51, %v673_v49  ;;  %v441_v49 = vadd.f32 %v3226_v40, %v339_v47  ;;  %v427_v51 = vadd.f32 %v3218_v34, %v339_v47  ;;  %v2538_v34 = vld [vmem:[#allocation16 + $0x48] sm:$0xff]   ;;  %v2540_v40 = vld [vmem:[#allocation16 + $0x40] sm:$0xff]  }
 0x354   :  { %v2371_v54 = vpop.f32.mrf.mxu0 }
 0x355   :  { %848 = vmatprep.mubr.bf16.mxu1 %v680_v53  ;;  %v431_v53 = vadd.f32 %v3222_v36, %v339_v47  ;;  %v509_v57 = vmax.f32 %v441_v49, 0.0  ;;  %v497_v59 = vmax.f32 %v427_v51, 0.0  ;;  %v2539_v36 = vld [vmem:[#allocation16 + $0x8] sm:$0xff]   ;;  %v1654_v49 = vstv %s2150_s3 }
 0x356   :  { %849 = vmatmul.mubr.bf16.vlgmr.msra.gmra.mxu1 %v3231_v52  ;;  %v3286_v52 = vpop.f32.mrf.mxu1 }
 0x357   :  { %2394 = vmatprep.mubr.msk.bf16.mxu1 %vm573_vm7, %v3212_v32 }
 0x358   :  { %v3288_v60 = vpop.f32.mrf.mxu1 }
 0x35a   :  { %v3290_v61 = vpop.f32.mrf.mxu1 }
 0x35c   :  { %v3292_v62 = vpop.f32.mrf.mxu1 }
 0x35e   :  { %v3294_v63 = vpop.f32.mrf.mxu1 }
 0x360   :  { %v3296_v0 = vpop.f32.mrf.mxu1 }
 0x362   :  { %v3298_v1 = vpop.f32.mrf.mxu1 }
 0x364   :  { %v3300_v2 = vpop.f32.mrf.mxu1 }
 0x416   :  { %v2235_v5 = vpop.f32.mrf.mxu1 }
 0x418   :  { %v2236_v6 = vpop.f32.mrf.mxu1 }
 0x419   :  { %v2237_v7 = vadd.f32 %v2236_v6, %v2235_v5  ;;  %v501_v5 = vmax.f32 %v431_v53, 0.0 }
 0x41a   :  { %v2238_v9 = vpop.f32.mrf.mxu1 }
 0x41b   :  { %v851_v11 = vadd.f32 %v2237_v7, %v2103_v8 }
 0x41c   :  { %v2239_v3 = vpop.f32.mrf.mxu1 }
 0x41d   :  { %v2240_v12 = vadd.f32 %v2239_v3, %v2238_v9  ;;  %v3302_v14 = vmax.f32 %v851_v11, 0.0 }
 0x41f   :  { %v854_v13 = vadd.f32 %v2240_v12, %v2103_v8  ;;  %v2541_v12 = vld [vmem:[#allocation16] sm:$0xff]  }
 0x421   :  { %v3304_v15 = vmax.f32 %v854_v13, 0.0  ;;  %v2542_v13 = vld [vmem:[#allocation19 + $0x38] sm:$0xff]  }
 0x423   :  { %v859_v16 = vpack.c.bf16 %v3304_v15, %v3302_v14 }
 0x425   :  { %2389 = vmatmul.mubr.bf16.vlgmr.msra.gmra.mxu0 %v859_v16  ;;  %v2543_v16 = vld [vmem:[#allocation19 + $0x30] sm:$0xff]  }
 0x426   :  { %2402 = vmatprep.mubr.msk.bf16.mxu0 %vm2963_vm4, %v2962_v20 }
 0x4e5   :  { %v965_v18 = vpop.f32.mrf.mxu0 }
 0x4e6   :  { %v966_v21 = vadd.f32 %v2120_v17, %v965_v18 }
 0x4e7   :  { %v2390_v19 = vpop.f32.mrf.mxu0 }
 0x4e8   :  { %v972_v25 = vmax.f32 %v966_v21, 0.0 }
 0x4e9   :  { %v968_v22 = vpop.f32.mrf.mxu0 }
 0x4ea   :  { %v969_v23 = vadd.f32 %v2120_v17, %v968_v22  ;;  %v2544_v17 = vld [vmem:[#allocation19 + $0x28] sm:$0xff]  }
 0x4eb   :  { %v2391_v24 = vpop.f32.mrf.mxu0 }
 0x4ec   :  { %v973_v26 = vmax.f32 %v969_v23, 0.0  ;;  %v2545_v24 = vld [vmem:[#allocation19 + $0x20] sm:$0xff]  }
 0x4ee   :  { %v3310_v27 = vpack.c.bf16 %v973_v26, %v972_v25  ;;  %v2546_v25 = vld [vmem:[#allocation19 + $0x18] sm:$0xff]   ;;  %v2547_v26 = vld [vmem:[#allocation19 + $0x10] sm:$0xff]  }
 0x4f0   :  { %2392 = vmatprep.subr.bf16.mxu1 %v3310_v27 }
 0x4f1   :  { %2393 = vmatpush3.bf16.msra.mxu1 %v3310_v27 }
 0x4f2   :  { %2256 = vmatprep.subr.bf16.mxu1 %v2526_v28  ;;  %v2548_v28 = vld [vmem:[#allocation19 + $0x8] sm:$0xff]  }
 0x4f4   :  { %2395 = vmatmul.mubr.msk.bf16.vlgmr.msra.gmra.mxu1 %vm573_vm7, %v3237_v55 }
 0x4f5   :  { %2257 = vmatpush3.bf16.msra.mxu1 %v2527_v29 }
 0x4f6   :  { %2258 = vmatprep.subr.bf16.mxu1 %v2528_v30  ;;  %v2132_v30 = vld [vmem:[#allocation18] ss:$0 sm:$0xff] }
 0x4f9   :  { %2259 = vmatpush3.bf16.msra.mxu1 %v2529_v31 }
 0x4fa   :  { %2260 = vmatprep.subr.bf16.mxu1 %v2530_v33 }
 0x4fd   :  { %2261 = vmatpush3.bf16.msra.mxu1 %v2531_v35 }
 0x4fe   :  { %2262 = vmatprep.subr.bf16.mxu1 %v2532_v37 }
 0x501   :  { %2263 = vmatpush3.bf16.msra.mxu1 %v2533_v41  ;;  %v1255_v41 = vstv %s1250_s18 }
 0x502   :  { %2264 = vmatprep.subr.bf16.mxu1 %v2534_v42  ;;  %v1258_v42 = vstv %s2149_s20  ;;  %v1256_v46 = vmul.f32 %v1255_v41, %v3302_v14 }
 0x505   :  { %2265 = vmatpush3.bf16.msra.mxu1 %v2535_v43 }
 0x506   :  { %2266 = vmatprep.subr.bf16.mxu1 %v2536_v44 }
 0x509   :  { %2267 = vmatpush3.bf16.msra.mxu1 %v2537_v45 }
 0x50a   :  { %2268 = vmatprep.subr.bf16.mxu1 %v2538_v34 }
 0x50d   :  { %2269 = vmatpush3.bf16.msra.mxu1 %v2539_v36 }
 0x50e   :  { %2270 = vmatprep.subr.bf16.mxu1 %v2540_v40 }
 0x511   :  { %2271 = vmatpush3.bf16.msra.mxu1 %v2541_v12 }
 0x5b4   :  { %v2396_v50 = vpop.f32.mrf.mxu1 }
 0x5b5   :  { %v1026_v6 = vmul.f32 %v2396_v50, %v505_v56  ;;  %v1657_v50 = vstv %s2151_s0  ;;  %v1257_v56 = vmul.f32 %v1255_v41, %v3304_v15 }
 0x5b6   :  { %v1009_v54 = vpop.f32.mrf.mxu1 }
 0x5b7   :  { %v1024_v9 = vmul.f32 %v1009_v54, %v497_v59  ;;  %v1655_v54 = vmul.f32 %v1654_v49, %v3302_v14 }
 0x5b8   :  { %v2397_v58 = vpop.f32.mrf.mxu1 }
 0x5b9   :  { %v1027_v7 = vmul.f32 %v2397_v58, %v509_v57 }
 0x5ba   :  { %v1012_v8 = vpop.f32.mrf.mxu1 }
 0x5bb   :  { %v1029_v3 = vpack.c.bf16 %v1027_v7, %v1026_v6  ;;  %v1025_v11 = vmul.f32 %v1012_v8, %v501_v5  ;;  %v1656_v6 = vmul.f32 %v1654_v49, %v3304_v15  ;;  %v2550_v15 = vld [vmem:[#allocation22 + $0x78] sm:$0xff]  }
 0x5bd   :  { %v1028_v38 = vpack.c.bf16 %v1025_v11, %v1024_v9  ;;  %2399 = vmatpush3.bf16.msra.mxu0 %v1029_v3  ;;  %v2153_v3 = vld [vmem:[#allocation21] ss:$0 sm:$0xff] }
 0x5be   :  { %2400 = vmatprep.subr.bf16.mxu0 %v2962_v20 }
 0x5c1   :  { %2401 = vmatpush3.bf16.msra.mxu0 %v1028_v38 }
 0x5c2   :  { %2406 = vmatprep.subr.bf16.mxu0 %v2962_v20 }
 0x5c4   :  { %2403 = vmatmul.mubr.msk.bf16.vlgmr.msra.gmra.mxu0 %vm635_vm12, %v3268_v39 }
 0x5c5   :  { %2422 = vmatprep.mubr.msk.bf16.mxu0 %vm2963_vm4, %v2962_v20  ;;  %2407 = vmatpush3.bf16.msra.mxu0 %v2542_v13 }
 0x5c6   :  { %2408 = vmatprep.subr.bf16.mxu0 %v2962_v20 }
 0x5c9   :  { %2409 = vmatpush3.bf16.msra.mxu0 %v2543_v16 }
 0x5ca   :  { %2410 = vmatprep.subr.bf16.mxu0 %v2962_v20 }
 0x5cd   :  { %2411 = vmatpush3.bf16.msra.mxu0 %v2544_v17  ;;  %v2551_v17 = vld [vmem:[#allocation22 + $0x38] sm:$0xff]  }
 0x5ce   :  { %2412 = vmatprep.subr.bf16.mxu0 %v2962_v20 }
 0x5d1   :  { %2413 = vmatpush3.bf16.msra.mxu0 %v2545_v24  ;;  %v2557_v24 = vld [vmem:[#allocation22 + $0x20] sm:$0xff]  }
 0x5d2   :  { %2414 = vmatprep.subr.bf16.mxu0 %v2962_v20 }
 0x5d5   :  { %2415 = vmatpush3.bf16.msra.mxu0 %v2546_v25  ;;  %v2558_v25 = vld [vmem:[#allocation22 + $0x58] sm:$0xff]  }
 0x5d6   :  { %2416 = vmatprep.subr.bf16.mxu0 %v2962_v20 }
 0x5d9   :  { %2417 = vmatpush3.bf16.msra.mxu0 %v2547_v26  ;;  %v2559_v26 = vld [vmem:[#allocation22 + $0x18] sm:$0xff]  }
 0x5da   :  { %2418 = vmatprep.subr.bf16.mxu0 %v2962_v20 }
 0x5dd   :  { %2419 = vmatpush3.bf16.msra.mxu0 %v2548_v28  ;;  %v2560_v28 = vld [vmem:[#allocation22 + $0x50] sm:$0xff]  }
 0x5de   :  { %2420 = vmatprep.subr.bf16.mxu0 %v2962_v20 }
 0x684   :  { %v1064_v18 = vpop.f32.mrf.mxu0 }
 0x686   :  { %v2404_v19 = vpop.f32.mrf.mxu0 }
 0x687   :  { %v2553_v19 = vld [vmem:[#allocation22 + $0x30] sm:$0xff]  }
 0x688   :  { %v1067_v21 = vpop.f32.mrf.mxu0 }
 0x689   :  { %v1071_v22 = vpack.c.bf16 %v1067_v21, %v1064_v18  ;;  %v2552_v18 = vld [vmem:[#allocation22 + $0x70] sm:$0xff]   ;;  %v2554_v21 = vld [vmem:[#allocation22 + $0x68] sm:$0xff]  }
 0x68a   :  { %v2405_v23 = vpop.f32.mrf.mxu0 }
 0x68b   :  { %1239 = vmatprep.mubr.bf16.mxu1 %v1071_v22  ;;  %v2555_v22 = vld [vmem:[#allocation22 + $0x28] sm:$0xff]   ;;  %v2556_v23 = vld [vmem:[#allocation22 + $0x60] sm:$0xff]  }
 0x68c   :  { %1240 = vmatmul.mubr.bf16.vlgmr.msra.gmra.mxu1 %v3310_v27  ;;  %v2549_v27 = vld [vmem:[#allocation19] sm:$0xff]  }
 0x68d   :  { %2428 = vmatprep.mubr.msk.bf16.mxu1 %vm573_vm7, %v3212_v32  ;;  %2421 = vmatpush3.bf16.msra.mxu0 %v2549_v27  ;;  %v2561_v27 = vld [vmem:[#allocation22 + $0x10] sm:$0xff]  }
 0x68e   :  { %2432 = vmatprep.subr.bf16.mxu0 %v2962_v20 }
 0x74c   :  { %v2272_v29 = vpop.f32.mrf.mxu1 }
 0x74e   :  { %v2273_v31 = vpop.f32.mrf.mxu1 }
 0x74f   :  { %v2274_v33 = vadd.f32 %v2273_v31, %v2272_v29  ;;  %v342_v29 = vsub.s32 2, %v3155_v4 }
 0x750   :  { %v2275_v35 = vpop.f32.mrf.mxu1 }
 0x751   :  { %v1242_v37 = vadd.f32 %v2274_v33, %v2132_v30 }
 0x752   :  { %v2276_v43 = vpop.f32.mrf.mxu1 }
 0x753   :  { %v1248_v44 = vmax.f32 %v1242_v37, 0.0  ;;  %v2277_v45 = vadd.f32 %v2276_v43, %v2275_v35 }
 0x755   :  { %v1259_v47 = vmul.f32 %v1258_v42, %v1248_v44  ;;  %v1245_v48 = vadd.f32 %v2277_v45, %v2132_v30  ;;  %v343_v30 = vrot.slane %v3255_v10, %v342_v29 }
 0x757   :  { %v1261_v51 = vadd.f32 %v1259_v47, %v1256_v46  ;;  %v1249_v53 = vmax.f32 %v1245_v48, 0.0  ;;  %v488_v31 = vadd.f32 %v3294_v63, %v343_v30  ;;  %v492_v33 = vadd.f32 %v3298_v1, %v343_v30  ;;  %v2564_v1 = vld [vmem:[#allocation22 + $0x40] sm:$0xff]  }
 0x758   :  { %v478_v37 = vadd.f32 %v3286_v52, %v343_v30  ;;  %v482_v41 = vadd.f32 %v3290_v61, %v343_v30  ;;  %v2562_v52 = vld [vmem:[#allocation22 + $0x48] sm:$0xff]   ;;  %v2182_v30 = vld [vmem:[#allocation27] ss:$0 sm:$0xff] }
 0x759   :  { %v1658_v57 = vmul.f32 %v1657_v50, %v1261_v51  ;;  %v1260_v58 = vmul.f32 %v1258_v42, %v1249_v53  ;;  %v506_v43 = vmax.f32 %v488_v31, 0.0  ;;  %v510_v44 = vmax.f32 %v492_v33, 0.0  ;;  %v2563_v61 = vld [vmem:[#allocation22 + $0x8] sm:$0xff]  }
 0x75a   :  { %v498_v46 = vmax.f32 %v478_v37, 0.0  ;;  %v502_v47 = vmax.f32 %v482_v41, 0.0 }
 0x75b   :  { %v1262_v59 = vadd.f32 %v1260_v58, %v1257_v56  ;;  %v3342_v5 = vadd.f32 %v1658_v57, %v1655_v54  ;;  %v2565_v56 = vld [vmem:[#allocation22] sm:$0xff]   ;;  %v2567_v58 = vld [vmem:[#allocation25 + $0x30] sm:$0xff]  }
 0x75c   :  { %v2566_v57 = vld [vmem:[#allocation25 + $0x38] sm:$0xff]  }
 0x75d   :  { %v1659_v7 = vmul.f32 %v1657_v50, %v1262_v59  ;;  %v1263_v8 = vpack.c.bf16 %v1262_v59, %v1261_v51  ;;  %v2568_v59 = vld [vmem:[#allocation25 + $0x28] sm:$0xff]  }
 0x75f   :  { %2423 = vmatmul.mubr.bf16.vlgmr.msra.gmra.mxu0 %v1263_v8  ;;  %v3345_v9 = vadd.f32 %v1659_v7, %v1656_v6 }
 0x760   :  { %2436 = vmatprep.mubr.msk.bf16.mxu0 %vm2963_vm4, %v2962_v20 }
 0x81f   :  { %v1369_v11 = vpop.f32.mrf.mxu0 }
 0x820   :  { %v1370_v38 = vadd.f32 %v2153_v3, %v1369_v11 }
 0x821   :  { %v2424_v14 = vpop.f32.mrf.mxu0 }
 0x822   :  { %v1376_v12 = vmax.f32 %v1370_v38, 0.0  ;;  %v2569_v14 = vld [vmem:[#allocation25 + $0x20] sm:$0xff]   ;;  %v2570_v38 = vld [vmem:[#allocation25 + $0x18] sm:$0xff]  }
 0x823   :  { %v1372_v34 = vpop.f32.mrf.mxu0 }
 0x824   :  { %v1373_v36 = vadd.f32 %v2153_v3, %v1372_v34  ;;  %v2571_v34 = vld [vmem:[#allocation25 + $0x10] sm:$0xff]  }
 0x825   :  { %v2425_v40 = vpop.f32.mrf.mxu0 }
 0x826   :  { %v1377_v13 = vmax.f32 %v1373_v36, 0.0  ;;  %v2572_v36 = vld [vmem:[#allocation25 + $0x8] sm:$0xff]   ;;  %v2573_v40 = vld [vmem:[#allocation25] sm:$0xff]  }
 0x828   :  { %v3349_v16 = vpack.c.bf16 %v1377_v13, %v1376_v12  ;;  %v2165_v12 = vld [vmem:[#allocation24] ss:$0 sm:$0xff] }
 0x82a   :  { %2426 = vmatprep.subr.bf16.mxu1 %v3349_v16 }
 0x82b   :  { %2427 = vmatpush3.bf16.msra.mxu1 %v3349_v16 }
 0x82c   :  { %2293 = vmatprep.subr.bf16.mxu1 %v2550_v15 }
 0x82e   :  { %2429 = vmatmul.mubr.msk.bf16.vlgmr.msra.gmra.mxu1 %vm573_vm7, %v3237_v55 }
 0x82f   :  { %2294 = vmatpush3.bf16.msra.mxu1 %v2551_v17 }
 0x830   :  { %2295 = vmatprep.subr.bf16.mxu1 %v2552_v18 }
 0x833   :  { %2296 = vmatpush3.bf16.msra.mxu1 %v2553_v19 }
 0x834   :  { %2297 = vmatprep.subr.bf16.mxu1 %v2554_v21 }
 0x837   :  { %2298 = vmatpush3.bf16.msra.mxu1 %v2555_v22  ;;  %v1662_v22 = vstv %s2152_s13 }
 0x838   :  { %2299 = vmatprep.subr.bf16.mxu1 %v2556_v23 }
 0x83b   :  { %2300 = vmatpush3.bf16.msra.mxu1 %v2557_v24 }
 0x83c   :  { %2301 = vmatprep.subr.bf16.mxu1 %v2558_v25 }
 0x83f   :  { %2302 = vmatpush3.bf16.msra.mxu1 %v2559_v26 }
 0x840   :  { %2303 = vmatprep.subr.bf16.mxu1 %v2560_v28 }
 0x843   :  { %2304 = vmatpush3.bf16.msra.mxu1 %v2561_v27 }
 0x844   :  { %2305 = vmatprep.subr.bf16.mxu1 %v2562_v52  ;;  %v346_v52 = vsub.s32 3, %v3155_v4 }
 0x847   :  { %2306 = vmatpush3.bf16.msra.mxu1 %v2563_v61  ;;  %v347_v61 = vrot.slane %v3255_v10, %v346_v52 }
 0x848   :  { %2307 = vmatprep.subr.bf16.mxu1 %v2564_v1 }
 0x849   :  { %v490_v1 = vadd.f32 %v3296_v0, %v347_v61 }
 0x84b   :  { %2308 = vmatpush3.bf16.msra.mxu1 %v2565_v56  ;;  %v494_v56 = vadd.f32 %v3300_v2, %v347_v61  ;;  %v2588_v2 = vld [vmem:[%s3473_s21 + $0x40] sm:$0xff]  }
 0x8ee   :  { %v2430_v35 = vpop.f32.mrf.mxu1 }
 0x8ef   :  { %v1430_v48 = vmul.f32 %v2430_v35, %v506_v43 }
 0x8f0   :  { %v1413_v42 = vpop.f32.mrf.mxu1 }
 0x8f1   :  { %v1428_v51 = vmul.f32 %v1413_v42, %v498_v46  ;;  %v2576_v46 = vld [vmem:[%s3473_s21 + $0x70] sm:$0xff]  }
 0x8f2   :  { %v2431_v45 = vpop.f32.mrf.mxu1 }
 0x8f3   :  { %v1431_v49 = vmul.f32 %v2431_v45, %v510_v44 }
 0x8f4   :  { %v1416_v50 = vpop.f32.mrf.mxu1 }
 0x8f5   :  { %v1433_v53 = vpack.c.bf16 %v1431_v49, %v1430_v48  ;;  %v1429_v54 = vmul.f32 %v1416_v50, %v502_v47  ;;  %v2577_v47 = vld [vmem:[%s3473_s21 + $0x30] sm:$0xff]   ;;  %v2579_v48 = vld [vmem:[%s3473_s21 + $0x28] sm:$0xff]   ;;  %v2580_v49 = vld [vmem:[%s3473_s21 + $0x60] sm:$0xff]  }
 0x8f6   :  { %v2581_v50 = vld [vmem:[%s3473_s21 + $0x20] sm:$0xff]  }
 0x8f7   :  { %v1432_v63 = vpack.c.bf16 %v1429_v54, %v1428_v51  ;;  %2433 = vmatpush3.bf16.msra.mxu0 %v1433_v53  ;;  %v2582_v51 = vld [vmem:[%s3473_s21 + $0x58] sm:$0xff]   ;;  %v2584_v54 = vld [vmem:[%s3473_s21 + $0x50] sm:$0xff]  }
 0x8f8   :  { %2434 = vmatprep.subr.bf16.mxu0 %v2962_v20  ;;  %v2583_v53 = vld [vmem:[%s3473_s21 + $0x18] sm:$0xff]  }
 0x8fb   :  { %2435 = vmatpush3.bf16.msra.mxu0 %v1432_v63  ;;  %v2585_v63 = vld [vmem:[%s3473_s21 + $0x10] sm:$0xff]  }
 0x8fc   :  { %2440 = vmatprep.subr.bf16.mxu0 %v2962_v20 }
 0x8fe   :  { %2437 = vmatmul.mubr.msk.bf16.vlgmr.msra.gmra.mxu0 %vm635_vm12, %v3268_v39 }
 0x8ff   :  { %2456 = vmatprep.mubr.msk.bf16.mxu0 %vm2963_vm4, %v2962_v20  ;;  %2441 = vmatpush3.bf16.msra.mxu0 %v2566_v57 }
 0x900   :  { %2442 = vmatprep.subr.bf16.mxu0 %v2962_v20 }
 0x903   :  { %2443 = vmatpush3.bf16.msra.mxu0 %v2567_v58  ;;  %v480_v58 = vadd.f32 %v3288_v60, %v347_v61  ;;  %v2586_v60 = vld [vmem:[%s3473_s21 + $0x48] sm:$0xff]  }
 0x904   :  { %2444 = vmatprep.subr.bf16.mxu0 %v2962_v20 }
 0x907   :  { %2445 = vmatpush3.bf16.msra.mxu0 %v2568_v59  ;;  %v484_v59 = vadd.f32 %v3292_v62, %v347_v61  ;;  %v2587_v62 = vld [vmem:[%s3473_s21 + $0x8] sm:$0xff]  }
 0x908   :  { %2446 = vmatprep.subr.bf16.mxu0 %v2962_v20 }
 0x90b   :  { %2447 = vmatpush3.bf16.msra.mxu0 %v2569_v14  ;;  %v503_v14 = vmax.f32 %v484_v59, 0.0 }
 0x90c   :  { %2448 = vmatprep.subr.bf16.mxu0 %v2962_v20 }
 0x90f   :  { %2449 = vmatpush3.bf16.msra.mxu0 %v2570_v38 }
 0x910   :  { %2450 = vmatprep.subr.bf16.mxu0 %v2962_v20 }
 0x913   :  { %2451 = vmatpush3.bf16.msra.mxu0 %v2571_v34 }
 0x914   :  { %2452 = vmatprep.subr.bf16.mxu0 %v2962_v20 }
 0x917   :  { %2453 = vmatpush3.bf16.msra.mxu0 %v2572_v36 }
 0x918   :  { %2454 = vmatprep.subr.bf16.mxu0 %v2962_v20 }
 0x91b   :  { %2455 = vmatpush3.bf16.msra.mxu0 %v2573_v40 }
 0x91c   :  { %2466 = vmatprep.subr.bf16.mxu0 %v2962_v20 }
 0x9be   :  { %v1468_v6 = vpop.f32.mrf.mxu0 }
 0x9c0   :  { %v2438_v7 = vpop.f32.mrf.mxu0 }
 0x9c1   :  { %v507_v7 = vmax.f32 %v490_v1, 0.0 }
 0x9c2   :  { %v1471_v8 = vpop.f32.mrf.mxu0 }
 0x9c3   :  { %v1475_v3 = vpack.c.bf16 %v1471_v8, %v1468_v6  ;;  %v511_v8 = vmax.f32 %v494_v56, 0.0 }
 0x9c4   :  { %v2439_v11 = vpop.f32.mrf.mxu0 }
 0x9c5   :  { %1643 = vmatprep.mubr.bf16.mxu1 %v1475_v3  ;;  %v499_v11 = vmax.f32 %v480_v58, 0.0 }
 0x9c6   :  { %1644 = vmatmul.mubr.bf16.vlgmr.msra.gmra.mxu1 %v3349_v16 }
 0x9c7   :  { %2462 = vmatprep.mubr.msk.bf16.mxu1 %vm573_vm7, %v3212_v32 }
 0xa86   :  { %v2309_v32 = vpop.f32.mrf.mxu1 }
 0xa88   :  { %v2310_v13 = vpop.f32.mrf.mxu1 }
 0xa89   :  { %v2311_v16 = vadd.f32 %v2310_v13, %v2309_v32 }
 0xa8a   :  { %v2312_v15 = vpop.f32.mrf.mxu1 }
 0xa8b   :  { %v1646_v17 = vadd.f32 %v2311_v16, %v2165_v12 }
 0xa8c   :  { %v2313_v18 = vpop.f32.mrf.mxu1 }
 0xa8d   :  { %v1652_v19 = vmax.f32 %v1646_v17, 0.0  ;;  %v2314_v21 = vadd.f32 %v2313_v18, %v2312_v15  ;;  %v2194_v17 = vld [vmem:[%s3474_s22] ss:$0 sm:$0xff] }
 0xa8f   :  { %v1649_v23 = vadd.f32 %v2314_v21, %v2165_v12  ;;  %v1663_v24 = vmul.f32 %v1662_v22, %v1652_v19 }
 0xa91   :  { %v1653_v25 = vmax.f32 %v1649_v23, 0.0  ;;  %v1665_v28 = vadd.f32 %v1663_v24, %v3342_v5  ;;  %v2574_v5 = vld [vmem:[%s3473_s21 + $0x78] sm:$0xff]  }
 0xa93   :  { %v1664_v26 = vmul.f32 %v1662_v22, %v1653_v25 }
 0xa95   :  { %v1666_v27 = vadd.f32 %v1664_v26, %v3345_v9  ;;  %v2575_v9 = vld [vmem:[%s3473_s21 + $0x38] sm:$0xff]  }
 0xa97   :  { %v1667_v29 = vpack.c.bf16 %v1666_v27, %v1665_v28 }
 0xa99   :  { %2457 = vmatmul.mubr.bf16.vlgmr.msra.gmra.mxu0 %v1667_v29 }
 0xa9a   :  { %2470 = vmatprep.mubr.msk.bf16.mxu0 %vm2963_vm4, %v2962_v20 }
 0xb59   :  { %v1773_v31 = vpop.f32.mrf.mxu0 }
 0xb5a   :  { %v1774_v35 = vadd.f32 %v2182_v30, %v1773_v31 }
 0xb5b   :  { %v2458_v33 = vpop.f32.mrf.mxu0 }
 0xb5c   :  { %v1780_v43 = vmax.f32 %v1774_v35, 0.0 }
 0xb5d   :  { %v1776_v37 = vpop.f32.mrf.mxu0 }
 0xb5e   :  { %v1777_v41 = vadd.f32 %v2182_v30, %v1776_v37 }
 0xb5f   :  { %v2459_v42 = vpop.f32.mrf.mxu0 }
 0xb60   :  { %v1781_v44 = vmax.f32 %v1777_v41, 0.0 }
 0xb62   :  { %v3382_v45 = vpack.c.bf16 %v1781_v44, %v1780_v43 }
 0xb64   :  { %2460 = vmatprep.subr.bf16.mxu1 %v3382_v45 }
 0xb65   :  { %2461 = vmatpush3.bf16.msra.mxu1 %v3382_v45 }
 0xb66   :  { %2330 = vmatprep.subr.bf16.mxu1 %v2574_v5 }
 0xb68   :  { %2463 = vmatmul.mubr.msk.bf16.vlgmr.msra.gmra.mxu1 %vm573_vm7, %v3237_v55  ;;  %v2578_v55 = vld [vmem:[%s3473_s21 + $0x68] sm:$0xff]  }
 0xb69   :  { %2331 = vmatpush3.bf16.msra.mxu1 %v2575_v9 }
 0xb6a   :  { %2332 = vmatprep.subr.bf16.mxu1 %v2576_v46 }
 0xb6d   :  { %2333 = vmatpush3.bf16.msra.mxu1 %v2577_v47 }
 0xb6e   :  { %2334 = vmatprep.subr.bf16.mxu1 %v2578_v55 }
 0xb71   :  { %2335 = vmatpush3.bf16.msra.mxu1 %v2579_v48 }
 0xb72   :  { %2336 = vmatprep.subr.bf16.mxu1 %v2580_v49 }
 0xb75   :  { %2337 = vmatpush3.bf16.msra.mxu1 %v2581_v50 }
 0xb76   :  { %2338 = vmatprep.subr.bf16.mxu1 %v2582_v51 }
 0xb79   :  { %2339 = vmatpush3.bf16.msra.mxu1 %v2583_v53 }
 0xb7a   :  { %2340 = vmatprep.subr.bf16.mxu1 %v2584_v54 }
 0xb7d   :  { %2341 = vmatpush3.bf16.msra.mxu1 %v2585_v63 }
 0xb7e   :  { %2342 = vmatprep.subr.bf16.mxu1 %v2586_v60 }
 0xb81   :  { %2343 = vmatpush3.bf16.msra.mxu1 %v2587_v62 }
 0xb82   :  { %2344 = vmatprep.subr.bf16.mxu1 %v2588_v2 }
 0xc28   :  { %v2464_v57 = vpop.f32.mrf.mxu1 }
 0xc29   :  { %v1834_v38 = vmul.f32 %v2464_v57, %v507_v7 }
 0xc2a   :  { %v1817_v6 = vpop.f32.mrf.mxu1 }
 0xc2b   :  { %v1832_v36 = vmul.f32 %v1817_v6, %v499_v11 }
 0xc2c   :  { %v2465_v3 = vpop.f32.mrf.mxu1 }
 0xc2d   :  { %v1835_v34 = vmul.f32 %v2465_v3, %v511_v8 }
 0xc2e   :  { %v1820_v4 = vpop.f32.mrf.mxu1 }
 0xc2f   :  { %v1837_v10 = vpack.c.bf16 %v1835_v34, %v1834_v38  ;;  %v1833_v40 = vmul.f32 %v1820_v4, %v503_v14 }
 0xc31   :  { %v1836_v0 = vpack.c.bf16 %v1833_v40, %v1832_v36  ;;  %2467 = vmatpush3.bf16.msra.mxu0 %v1837_v10 }
 0xc32   :  { %2468 = vmatprep.subr.bf16.mxu0 %v2962_v20  ;;  %v2589_v20 = vld [vmem:[%s3473_s21] sm:$0xff]   ;;  %s2964_s21 = smov [#allocation28]  }
 0xc33   :  { %2345 = vmatpush3.bf16.msra.mxu1 %v2589_v20  ;;  %s2065_s24 = sshll.u32 %s2964_s21, 4  ;;  %s2066_s24 = int_to_ptr.vmem [resolvable:$true] %s2065_s24 }
 0xc34   :  { %s2902_s12 = scalar_lea.vmem %s2066_s24, 256  ;;  %p2907_p11 = scmp.lt.s32.totalorder %s2066_s24, %s2066_s24 }
 0xc35   :  { %2469 = vmatpush3.bf16.msra.mxu0 %v1836_v0  ;;  %p2903_p10 = scmp.ne.s32.totalorder %s2066_s24, %s2902_s12  ;;  %p2908_p12 = scmp.lt.s32.totalorder %s2902_s12, %s2902_s12 }
 0xc37   :  { %p2909_p13 = por %p2908_p12, %p2907_p11 }
 0xc38   :  { %2471 = vmatmul.mubr.msk.bf16.vlgmr.msra.gmra.mxu0 %vm635_vm12, %v3268_v39 }
 0xc39   :  { %p2910_p0 = pnand %p2909_p13, %p2903_p10 }
 0xcf8   :  { %v1872_v39 = vpop.f32.mrf.mxu0 }
 0xcfa   :  { %v2472_v32 = vpop.f32.mrf.mxu0 }
 0xcfc   :  { %v1875_v12 = vpop.f32.mrf.mxu0 }
 0xcfd   :  { %v1879_v13 = vpack.c.bf16 %v1875_v12, %v1872_v39 }
 0xcfe   :  { %v2473_v16 = vpop.f32.mrf.mxu0 }
 0xcff   :  { %2047 = vmatprep.mubr.bf16.mxu1 %v1879_v13 }
 0xd00   :  { %2048 = vmatmul.mubr.bf16.vlgmr.msra.gmra.mxu1 %v3382_v45 }
 0xdc0   :  { %v2346_v15 = vpop.f32.mrf.mxu1 }
 0xdc2   :  { %v2347_v18 = vpop.f32.mrf.mxu1 }
 0xdc3   :  { %v2348_v19 = vadd.f32 %v2347_v18, %v2346_v15 }
 0xdc4   :  { %v2349_v21 = vpop.f32.mrf.mxu1 }
 0xdc5   :  { %v2050_v22 = vadd.f32 %v2348_v19, %v2194_v17 }
 0xdc6   :  { %v2350_v23 = vpop.f32.mrf.mxu1 }
 0xdc7   :  { %v2056_v24 = vmax.f32 %v2050_v22, 0.0  ;;  %v2351_v25 = vadd.f32 %v2350_v23, %v2349_v21 }
 0xdc9   :  { %2058 = vst [vmem:[#allocation28] sm:$0xff] %v2056_v24  ;;  %v2053_v26 = vadd.f32 %v2351_v25, %v2194_v17 }
 0xdcb   :  { %v2057_v28 = vmax.f32 %v2053_v26, 0.0 }
 0xdcd   :  { %2059 = vst [vmem:[#allocation28 + $0x8] sm:$0xff] %v2057_v28 }
 0xdce   :  { %2913 = shalt.err (!%p2910_p0)
}
 0xdcf   :  { %s2965_s22 = smov 128   ;;  %s2966_s5 = smov 8  }
 0xdd0   :  { %2071 = dma.vmem_to_hbm [thread:$0]  %s2066_s24, 256, %s3475_s23, [#allocation4], %s2965_s22, %s2965_s22, %s2966_s5  }
 0xdd1   :  { %2940 = dma.done.wait [#allocation4], 256  }
 0xdd2   :  { %2941 = vsyncadd [#allocation4], 4294967040 }
 0xdd3   :  { %2075 = vsyncpa [#allocation3], 1 }
 0xdd4   :  { %2076 = vsyncpa [#allocation8], 1 }
 0xdd5   :  { %2077 = vsyncpa [#allocation11], 1 }
 0xdd6   :  { %2078 = vsyncpa [#allocation14], 1 }
 0xdd7   :  { %2079 = vsyncpa [#allocation17], 1 }
 0xdd8   :  { %2080 = vsyncpa [#allocation20], 1 }
 0xdd9   :  { %2081 = vsyncpa [#allocation23], 1 }
 0xdda   :  { %2082 = vsyncpa [#allocation26], 1 }
 0xddb   :  { %2083 = vsyncpa [#allocation4], 1 }
 0xddc   :  { %2084 = vsyncpa [#allocation5], 1 }

</bundles_post_ra>
